<compile_context>
chip_gen: v7x
topology: tpu7x:2x2x1
jax: 0.10.0
libtpu: 0.0.40
codegen_flags: <defaults>
</compile_context>

<pallas_src>
import functools

import numpy as np
import jax
import jax.numpy as jnp
from jax.experimental import pallas as pl
from jax.experimental.pallas import tpu as pltpu

_VMEM_LIMIT = 32 * 1024 * 1024   # explicit: v5e's scoped default is only 16 MiB


def _round_up(x, m):
    return ((x + m - 1) // m) * m


def _pick_block(n, pref, align=128):
    """Largest tile <= pref dividing n; if it would collapse a *parallel* grid
    axis to a single step and n is big enough, halve it so v7x's two
    TensorCores both get work (no effect on v5e/v6e single-core)."""
    t = min(pref, n)
    while n % t != 0:
        t //= 2
    if t == n and n >= 2 * align and (n // 2) % align == 0:
        t = n // 2
    return max(t, 1)


def _pick_ts(n, pref):
    t = min(pref, n)
    while n % t != 0:
        t //= 2
    return max(t, 1)


# ----------------------------------------------------------------------------
# Kernel 1: stand-in backbone (stride-8 patchify conv as one fused matmul).
#   acc = X @ [W_reg | w_sa | 0...] + [b_reg | b_sa | 0...]
#   sa  = tanh(acc[:, sa_col])            (saliency head, f32, (M,1))
#   reg = acc with the sa column zeroed   (bf16, lane-dense (M,128))
# Tiled over M rows; weights/bias/one-hot stay resident.
# ----------------------------------------------------------------------------
def _backbone_kernel(x_ref, w_ref, b_ref, sel_ref, reg_ref, sa_ref):
    acc = jnp.dot(x_ref[...], w_ref[...],
                  preferred_element_type=jnp.float32) + b_ref[...]
    sel = sel_ref[...]                                   # (1, cpad) one-hot @ sa col
    # tanh only on the single saliency column (EUP work = tm elements, not tm*128)
    sa_ref[...] = jnp.tanh(jnp.sum(acc * sel, axis=1, keepdims=True))
    # zero the saliency column so the padded slab is safe for the conf contraction
    reg_ref[...] = (acc * (1.0 - sel)).astype(jnp.bfloat16)


def backbone_pallas(patches, w_comb, b_comb, sel_row, tm=512):
    M, K = patches.shape
    cpad = w_comb.shape[1]
    tm = _pick_block(M, tm)
    assert M % tm == 0
    return pl.pallas_call(
        _backbone_kernel,
        out_shape=(jax.ShapeDtypeStruct((M, cpad), jnp.bfloat16),
                   jax.ShapeDtypeStruct((M, 1), jnp.float32)),
        grid=(M // tm,),
        in_specs=[
            pl.BlockSpec((tm, K), lambda i: (i, 0)),
            pl.BlockSpec((K, cpad), lambda i: (0, 0)),
            pl.BlockSpec((1, cpad), lambda i: (0, 0)),
            pl.BlockSpec((1, cpad), lambda i: (0, 0)),
        ],
        out_specs=(
            pl.BlockSpec((tm, cpad), lambda i: (i, 0)),
            pl.BlockSpec((tm, 1), lambda i: (i, 0)),
        ),
        compiler_params=pltpu.CompilerParams(
            dimension_semantics=("parallel",),
            vmem_limit_bytes=_VMEM_LIMIT),
    )(patches, w_comb, b_comb, sel_row)


# ----------------------------------------------------------------------------
# Kernel 2: tiled confidence reduction.
#   conf[l,s] = <reg_vi[l], reg_ir[s]> * scale, invalid-saliency -> -1e30.
# Emits only:
#   row_max (L,1), row_arg (L,1)  -- accumulated over the si grid axis
#                                    (resident output blocks, si innermost),
#   col_part (nli,1,S)            -- one lane-dense partial-col-max row per li
#                                    block; finished with a tiny XLA max.
# No (L,S) conf/mask materialization, no cross-li state -> li is "parallel".
# Both operand blocks are read straight out of the backbone's (2L, cpad) slab.
# ----------------------------------------------------------------------------
def _conf_reduce_kernel(a_ref, b_ref, sav_ref, sai_ref,
                        rmax_ref, rarg_ref, cpart_ref, *, ts, scale):
    si = pl.program_id(1)

    conf = jax.lax.dot_general(
        a_ref[...], b_ref[...],
        dimension_numbers=(((1,), (1,)), ((), ())),        # contract last dims
        preferred_element_type=jnp.float32) * jnp.float32(scale)
    valid = (sav_ref[...] > 0.0) & (sai_ref[...] > 0.0)    # (tl,1)&(1,ts)->(tl,ts)
    conf = jnp.where(valid, conf, jnp.float32(-1e30))

    # ---- per-row running max / first-argmax, accumulated across si ---------
    tile_max = jnp.max(conf, axis=1, keepdims=True)                  # (tl,1)
    s_idx = jax.lax.broadcasted_iota(jnp.int32, conf.shape, 1)
    tile_arg = jnp.min(jnp.where(conf == tile_max, s_idx, jnp.int32(2 ** 30)),
                       axis=1, keepdims=True) + si * ts              # global s

    @pl.when(si == 0)
    def _():
        rmax_ref[...] = tile_max
        rarg_ref[...] = tile_arg

    @pl.when(si > 0)
    def _():
        prev_max = rmax_ref[...]
        better = tile_max > prev_max    # strict: keep earliest s on exact ties
        rmax_ref[...] = jnp.where(better, tile_max, prev_max)
        rarg_ref[...] = jnp.where(better, tile_arg, rarg_ref[...])

    # ---- per-(li,si) partial column max: distinct output block per step ----
    cpart_ref[...] = jnp.max(conf, axis=0, keepdims=True).reshape(1, 1, ts)


def conf_reduce_pallas(feats_reg, sa_all, sa_ir_row, L, S, scale,
                       tl=256, ts=512):
    twoL, cpad = feats_reg.shape
    assert twoL == L + S
    tl = _pick_block(L, tl)
    ts = _pick_ts(S, ts)
    assert L % tl == 0 and S % ts == 0 and L % ts == 0
    nli, nsi = L // tl, S // ts
    ir_blk0 = L // ts                                     # first IR block index
    kernel = functools.partial(_conf_reduce_kernel, ts=ts, scale=scale)
    row_max, row_arg, col_part = pl.pallas_call(
        kernel,
        out_shape=(
            jax.ShapeDtypeStruct((L, 1), jnp.float32),     # row max
            jax.ShapeDtypeStruct((L, 1), jnp.int32),       # row argmax (global s)
            jax.ShapeDtypeStruct((nli, 1, S), jnp.float32)  # per-li col-max partials
        ),
        grid=(nli, nsi),
        in_specs=[
            pl.BlockSpec((tl, cpad), lambda li, si: (li, 0)),            # VI rows
            pl.BlockSpec((ts, cpad), lambda li, si: (ir_blk0 + si, 0)),  # IR rows
            pl.BlockSpec((tl, 1), lambda li, si: (li, 0)),               # sa_vi
            pl.BlockSpec((1, ts), lambda li, si: (0, si)),               # sa_ir
        ],
        out_specs=(
            pl.BlockSpec((tl, 1), lambda li, si: (li, 0)),
            pl.BlockSpec((tl, 1), lambda li, si: (li, 0)),
            pl.BlockSpec((1, 1, ts), lambda li, si: (li, 0, si)),
        ),
        compiler_params=pltpu.CompilerParams(
            dimension_semantics=("parallel", "arbitrary"),
            vmem_limit_bytes=_VMEM_LIMIT),
    )(feats_reg, feats_reg, sa_all, sa_ir_row)
    col_max = jnp.max(col_part, axis=0)                   # (1, S) trivial XLA reduce
    return row_max, row_arg, col_max


# ----------------------------------------------------------------------------
# Kernel 3: 8x bilinear upsample (align_corners=True), row-interp matmul only.
# The column-interp factor (sa @ Wc^T, shape (h, Wout)) is hoisted to a tiny
# XLA matmul in the wrapper, so each tile is one lane-dense MXU matmul.
# ----------------------------------------------------------------------------
def _upsample_kernel(wr_ref, t_ref, out_ref):
    out_ref[...] = jnp.dot(wr_ref[...], t_ref[...],
                           preferred_element_type=jnp.float32)


def upsample_pallas(wr, tmp, tr=256):
    Hout, h = wr.shape
    _, Wout = tmp.shape
    tr = _pick_block(Hout, tr)
    assert Hout % tr == 0
    return pl.pallas_call(
        _upsample_kernel,
        out_shape=jax.ShapeDtypeStruct((Hout, Wout), jnp.float32),
        grid=(Hout // tr,),
        in_specs=[
            pl.BlockSpec((tr, h), lambda i: (i, 0)),
            pl.BlockSpec((h, Wout), lambda i: (0, 0)),
        ],
        out_specs=pl.BlockSpec((tr, Wout), lambda i: (i, 0)),
        compiler_params=pltpu.CompilerParams(
            dimension_semantics=("parallel",),
            vmem_limit_bytes=_VMEM_LIMIT),
    )(wr, tmp)


# ----------------------------------------------------------------------------
# Glue
# ----------------------------------------------------------------------------
def bilinear_matrix(n_in, n_out):
    """Row-interpolation matrix for F.interpolate(..., align_corners=True)."""
    W = np.zeros((n_out, n_in), np.float32)
    if n_in == 1:
        W[:, 0] = 1.0
        return jnp.asarray(W)
    src = np.arange(n_out, dtype=np.float64) * (n_in - 1) / (n_out - 1)
    i0 = np.clip(np.floor(src).astype(np.int64), 0, n_in - 2)
    t = (src - i0).astype(np.float32)
    W[np.arange(n_out), i0] = 1.0 - t
    W[np.arange(n_out), i0 + 1] = t
    return jnp.asarray(W)


@jax.jit
def semla_forward(img_vi, img_ir, params):
    """Fixed-shape part of SemLA.forward (batch N = 1, as the PyTorch indexing
    implies). Returns (row_max, row_arg, col_max, feat_sa_vi, feat_sa_ir,
    sa_ir_up); matches are reconstructed on host in semla_postprocess."""
    w_reg, b_reg, w_sa, b_sa = params
    N, Cin, H, W = img_vi.shape
    h, w = H // 8, W // 8
    L = N * h * w
    S = L
    creg = w_reg.shape[1]
    K = Cin * 64
    cpad = _round_up(creg + 1, 128)                       # lane-dense feature width
    sa_col = creg

    x = jnp.concatenate([img_vi, img_ir], axis=0)         # (2N, Cin, H, W)
    # patchify for the stride-8 conv: (2N*h*w, Cin*8*8), bf16 matmul inputs.
    patches = (
        x.reshape(2 * N, Cin, h, 8, w, 8)
        .transpose(0, 2, 4, 1, 3, 5)
        .reshape(2 * N * h * w, K)
    ).astype(jnp.bfloat16)

    w_comb = (
        jnp.zeros((K, cpad), jnp.float32)
        .at[:, :creg].set(w_reg)
        .at[:, sa_col].set(w_sa[:, 0])
    ).astype(jnp.bfloat16)
    b_comb = (
        jnp.zeros((1, cpad), jnp.float32)
        .at[:, :creg].set(b_reg)
        .at[:, sa_col].set(b_sa[0, 0])
    )
    sel_row = jnp.zeros((1, cpad), jnp.float32).at[:, sa_col].set(1.0)

    # reg: (2L, cpad) bf16 with the saliency column zeroed; sa: (2L, 1) f32.
    feats_reg, sa = backbone_pallas(patches, w_comb, b_comb, sel_row)

    feat_sa_vi = sa[:L].reshape(N, 1, h, w)
    feat_sa_ir = sa[L:].reshape(N, 1, h, w)
    sa_ir_row = sa[L:].reshape(1, S)                      # tiny (1,S) transpose

    # (A/sqrt(c)).(B/sqrt(c)) / 0.1 == (A.B) / (c*0.1); zero padding adds 0.
    row_max, row_arg, col_max = conf_reduce_pallas(
        feats_reg, sa, sa_ir_row, L, S, scale=1.0 / (creg * 0.1))

    wr = bilinear_matrix(h, 8 * h)                        # (8h, h)
    wct = bilinear_matrix(w, 8 * w).T                     # (w, 8w)
    tmp = jnp.dot(feat_sa_ir[0, 0], wct)                  # hoisted (h, 8w), tiny XLA
    sa_ir_up = upsample_pallas(wr, tmp).reshape(N, 1, 8 * h, 8 * w)

    return row_max, row_arg, col_max, feat_sa_vi, feat_sa_ir, sa_ir_up


def semla_postprocess(row_max, row_arg, col_max, feat_sa_vi):
    """Host-side dynamic-shape part (torch.where / variable-length gathers).
    A pair (l, row_arg[l]) is a mutual nearest neighbour iff its confidence is
    both the row max and the column max and is > 0 (invalid-saliency entries
    carry the -1e30 sentinel so they never pass)."""
    w = feat_sa_vi.shape[3]
    row_max = np.asarray(row_max).reshape(-1)
    row_arg = np.asarray(row_arg).reshape(-1)
    col_max = np.asarray(col_max).reshape(-1)
    mutual = (row_max > 0.0) & (row_max == col_max[row_arg])
    i_ids = np.where(mutual)[0]
    j_ids = row_arg[i_ids]
    mkpts0 = np.stack([i_ids % w, i_ids // w], axis=1) * 8
    mkpts1 = np.stack([j_ids % w, j_ids // w], axis=1) * 8
    score = row_max[i_ids]
    return mkpts0, mkpts1, score


if __name__ == "__main__":
    key = jax.random.PRNGKey(0)
    k_vi, k_ir, k1, k2, k3, k4 = jax.random.split(key, 6)

    # stride-8 backbone -> 16x16 coarse grid (L = S = 256): real tiling with
    # two parallel li blocks (v7x-shardable) and a 256-wide si block.
    N, Cin, H, W = 1, 1, 128, 128
    Creg = 32

    img_vi = jax.random.normal(k_vi, (N, Cin, H, W), jnp.float32)
    img_ir = jax.random.normal(k_ir, (N, Cin, H, W), jnp.float32)

    # deterministic synthetic parameters (stand-in backbone)
    w_reg = 0.1 * jax.random.normal(k1, (Cin * 64, Creg), jnp.float32)
    b_reg = 0.01 * jax.random.normal(k2, (1, Creg), jnp.float32)
    w_sa = 0.1 * jax.random.normal(k3, (Cin * 64, 1), jnp.float32)
    b_sa = 0.01 * jax.random.normal(k4, (1, 1), jnp.float32)
    params = (w_reg, b_reg, w_sa, b_sa)

    outs = jax.block_until_ready(semla_forward(img_vi, img_ir, params))
    row_max, row_arg, col_max, feat_sa_vi, feat_sa_ir, sa_ir_up = outs

    mkpts0, mkpts1, score = semla_postprocess(row_max, row_arg, col_max, feat_sa_vi)

    h, w = H // 8, W // 8
    L = N * h * w
    assert feat_sa_vi.shape == (N, 1, h, w)
    assert feat_sa_ir.shape == (N, 1, h, w)
    assert sa_ir_up.shape == (N, 1, H, W)
    assert row_max.shape == (L, 1) and row_arg.shape == (L, 1)
    assert col_max.shape == (1, L)
    assert mkpts0.shape == mkpts1.shape and mkpts0.shape[0] == score.shape[0]

    print("KERNEL_OK")
</pallas_src>

<mosaic_0001>
module attributes {stable_mosaic.version = 11 : i64} {
  func.func @_backbone_kernel(%arg0: i32, %arg1: memref<256x64xbf16, #tpu.memory_space<vmem>>, %arg2: memref<64x128xbf16, #tpu.memory_space<vmem>>, %arg3: memref<1x128xf32, #tpu.memory_space<vmem>>, %arg4: memref<1x128xf32, #tpu.memory_space<vmem>>, %arg5: memref<256x128xbf16, #tpu.memory_space<vmem>>, %arg6: memref<256x1xf32, #tpu.memory_space<vmem>>) attributes {dimension_semantics = [#tpu.dimension_semantics<parallel>], iteration_bounds = array<i64: 2>, scalar_prefetch = 0 : i64, scratch_operands = 0 : i64, tpu.core_type = #tpu.core_type<tc>, window_params = [{transform_indices = @transform_0, window_bounds = array<i64: 256, 64>}, {pipeline_mode = #tpu.pipeline_mode<synchronous>, transform_indices = @transform_1, window_bounds = array<i64: 64, 128>}, {pipeline_mode = #tpu.pipeline_mode<synchronous>, transform_indices = @transform_2, window_bounds = array<i64: 1, 128>}, {pipeline_mode = #tpu.pipeline_mode<synchronous>, transform_indices = @transform_3, window_bounds = array<i64: 1, 128>}, {transform_indices = @transform_4, window_bounds = array<i64: 256, 128>}, {transform_indices = @transform_5, window_bounds = array<i64: 256, 1>}]} {
    %c0 = arith.constant 0 : index
    %c0_0 = arith.constant 0 : index
    %0 = vector.load %arg1[%c0, %c0_0] : memref<256x64xbf16, #tpu.memory_space<vmem>>, vector<256x64xbf16>
    %c0_1 = arith.constant 0 : index
    %c0_2 = arith.constant 0 : index
    %1 = vector.load %arg2[%c0_1, %c0_2] : memref<64x128xbf16, #tpu.memory_space<vmem>>, vector<64x128xbf16>
    %cst = arith.constant dense<0.000000e+00> : vector<256x128xf32>
    %2 = tpu.matmul %0, %1, %cst {dimension_numbers = #tpu.dot_dimension_numbers<[1], [0], [0], [1], [0, 0, 1, 1], [], []>} : vector<256x64xbf16>, vector<64x128xbf16>, vector<256x128xf32> -> vector<256x128xf32>
    %c0_3 = arith.constant 0 : index
    %c0_4 = arith.constant 0 : index
    %3 = vector.load %arg3[%c0_3, %c0_4] : memref<1x128xf32, #tpu.memory_space<vmem>>, vector<1x128xf32>
    %4 = vector.broadcast %3 : vector<1x128xf32> to vector<256x128xf32>
    %5 = arith.addf %2, %4 : vector<256x128xf32>
    %c0_5 = arith.constant 0 : index
    %c0_6 = arith.constant 0 : index
    %6 = vector.load %arg4[%c0_5, %c0_6] : memref<1x128xf32, #tpu.memory_space<vmem>>, vector<1x128xf32>
    %7 = vector.broadcast %6 : vector<1x128xf32> to vector<256x128xf32>
    %8 = arith.mulf %5, %7 : vector<256x128xf32>
    %cst_7 = arith.constant dense<0.000000e+00> : vector<256xf32>
    %9 = vector.multi_reduction <add>, %8, %cst_7 [1] : vector<256x128xf32> to vector<256xf32>
    %10 = vector.shape_cast %9 : vector<256xf32> to vector<256x1xf32>
    %11 = math.tanh %10 : vector<256x1xf32>
    %c0_8 = arith.constant 0 : index
    %c0_9 = arith.constant 0 : index
    %12 = vector.load %arg6[%c0_8, %c0_9] : memref<256x1xf32, #tpu.memory_space<vmem>>, vector<256x1xf32>
    tpu.vector_store %arg6[%c0_8, %c0_9], %11 {strides = array<i32>} : memref<256x1xf32, #tpu.memory_space<vmem>>, vector<256x1xf32>,
    %cst_10 = arith.constant 1.000000e+00 : f32
    %13 = vector.broadcast %cst_10 : f32 to vector<1x128xf32>
    %14 = arith.subf %13, %6 : vector<1x128xf32>
    %15 = vector.broadcast %14 : vector<1x128xf32> to vector<256x128xf32>
    %16 = arith.mulf %5, %15 : vector<256x128xf32>
    %17 = arith.truncf %16 : vector<256x128xf32> to vector<256x128xbf16>
    %c0_11 = arith.constant 0 : index
    %c0_12 = arith.constant 0 : index
    %18 = vector.load %arg5[%c0_11, %c0_12] : memref<256x128xbf16, #tpu.memory_space<vmem>>, vector<256x128xbf16>
    tpu.vector_store %arg5[%c0_11, %c0_12], %17 {strides = array<i32>} : memref<256x128xbf16, #tpu.memory_space<vmem>>, vector<256x128xbf16>,
    return
  }
  func.func @transform_0(%arg0: i32) -> (i32, i32) {
    %c0_i32 = arith.constant 0 : i32
    %c0_i32_0 = arith.constant 0 : i32
    return %arg0, %c0_i32 : i32, i32
  }
  func.func @transform_1(%arg0: i32) -> (i32, i32) {
    %c0_i32 = arith.constant 0 : i32
    %c0_i32_0 = arith.constant 0 : i32
    %c0_i32_1 = arith.constant 0 : i32
    return %c0_i32, %c0_i32_0 : i32, i32
  }
  func.func @transform_2(%arg0: i32) -> (i32, i32) {
    %c0_i32 = arith.constant 0 : i32
    %c0_i32_0 = arith.constant 0 : i32
    %c0_i32_1 = arith.constant 0 : i32
    return %c0_i32, %c0_i32_0 : i32, i32
  }
  func.func @transform_3(%arg0: i32) -> (i32, i32) {
    %c0_i32 = arith.constant 0 : i32
    %c0_i32_0 = arith.constant 0 : i32
    %c0_i32_1 = arith.constant 0 : i32
    return %c0_i32, %c0_i32_0 : i32, i32
  }
  func.func @transform_4(%arg0: i32) -> (i32, i32) {
    %c0_i32 = arith.constant 0 : i32
    %c0_i32_0 = arith.constant 0 : i32
    return %arg0, %c0_i32 : i32, i32
  }
  func.func @transform_5(%arg0: i32) -> (i32, i32) {
    %c0_i32 = arith.constant 0 : i32
    %c0_i32_0 = arith.constant 0 : i32
    return %arg0, %c0_i32 : i32, i32
  }
}

module attributes {stable_mosaic.version = 11 : i64} {
  func.func @_conf_reduce_kernel(%arg0: i32, %arg1: i32, %arg2: memref<128x128xbf16, #tpu.memory_space<vmem>>, %arg3: memref<256x128xbf16, #tpu.memory_space<vmem>>, %arg4: memref<128x1xf32, #tpu.memory_space<vmem>>, %arg5: memref<1x256xf32, #tpu.memory_space<vmem>>, %arg6: memref<128x1xf32, #tpu.memory_space<vmem>>, %arg7: memref<128x1xi32, #tpu.memory_space<vmem>>, %arg8: memref<1x1x256xf32, #tpu.memory_space<vmem>>) attributes {dimension_semantics = [#tpu.dimension_semantics<parallel>, #tpu.dimension_semantics<arbitrary>], iteration_bounds = array<i64: 2, 1>, scalar_prefetch = 0 : i64, scratch_operands = 0 : i64, tpu.core_type = #tpu.core_type<tc>, window_params = [{transform_indices = @transform_0, window_bounds = array<i64: 128, 128>}, {transform_indices = @transform_1, window_bounds = array<i64: 256, 128>}, {transform_indices = @transform_2, window_bounds = array<i64: 128, 1>}, {transform_indices = @transform_3, window_bounds = array<i64: 1, 256>}, {transform_indices = @transform_4, window_bounds = array<i64: 128, 1>}, {transform_indices = @transform_5, window_bounds = array<i64: 128, 1>}, {transform_indices = @transform_6, window_bounds = array<i64: 1, 1, 256>}]} {
    %c0 = arith.constant 0 : index
    %c0_0 = arith.constant 0 : index
    %0 = vector.load %arg2[%c0, %c0_0] : memref<128x128xbf16, #tpu.memory_space<vmem>>, vector<128x128xbf16>
    %c0_1 = arith.constant 0 : index
    %c0_2 = arith.constant 0 : index
    %1 = vector.load %arg3[%c0_1, %c0_2] : memref<256x128xbf16, #tpu.memory_space<vmem>>, vector<256x128xbf16>
    %cst = arith.constant dense<0.000000e+00> : vector<128x256xf32>
    %2 = tpu.matmul %0, %1, %cst {dimension_numbers = #tpu.dot_dimension_numbers<[1], [1], [0], [0], [0, 0, 1, 0], [], []>} : vector<128x128xbf16>, vector<256x128xbf16>, vector<128x256xf32> -> vector<128x256xf32>
    %cst_3 = arith.constant 3.125000e-01 : f32
    %3 = vector.broadcast %cst_3 : f32 to vector<128x256xf32>
    %4 = arith.mulf %2, %3 : vector<128x256xf32>
    %c0_4 = arith.constant 0 : index
    %c0_5 = arith.constant 0 : index
    %5 = vector.load %arg4[%c0_4, %c0_5] : memref<128x1xf32, #tpu.memory_space<vmem>>, vector<128x1xf32>
    %cst_6 = arith.constant 0.000000e+00 : f32
    %6 = vector.broadcast %cst_6 : f32 to vector<128x1xf32>
    %7 = arith.cmpf ogt, %5, %6 : vector<128x1xf32>
    %c0_7 = arith.constant 0 : index
    %c0_8 = arith.constant 0 : index
    %8 = vector.load %arg5[%c0_7, %c0_8] : memref<1x256xf32, #tpu.memory_space<vmem>>, vector<1x256xf32>
    %cst_9 = arith.constant 0.000000e+00 : f32
    %9 = vector.broadcast %cst_9 : f32 to vector<1x256xf32>
    %10 = arith.cmpf ogt, %8, %9 : vector<1x256xf32>
    %11 = vector.broadcast %7 : vector<128x1xi1> to vector<128x256xi1>
    %12 = vector.broadcast %10 : vector<1x256xi1> to vector<128x256xi1>
    %13 = arith.andi %11, %12 : vector<128x256xi1>
    %cst_10 = arith.constant -1.000000e+30 : f32
    %14 = vector.broadcast %cst_10 : f32 to vector<128x256xf32>
    %15 = arith.select %13, %4, %14 : vector<128x256xi1>, vector<128x256xf32>
    %cst_11 = arith.constant dense<0xFF800000> : vector<128xf32>
    %16 = vector.multi_reduction <maximumf>, %15, %cst_11 [1] : vector<128x256xf32> to vector<128xf32>
    %17 = vector.shape_cast %16 : vector<128xf32> to vector<128x1xf32>
    %18 = tpu.iota {dimensions = array<i32: 1>} : vector<128x256xi32>
    %19 = vector.broadcast %17 : vector<128x1xf32> to vector<128x256xf32>
    %20 = arith.cmpf oeq, %15, %19 : vector<128x256xf32>
    %c1073741824_i32 = arith.constant 1073741824 : i32
    %21 = vector.broadcast %c1073741824_i32 : i32 to vector<128x256xi32>
    %22 = arith.select %20, %18, %21 : vector<128x256xi1>, vector<128x256xi32>
    %cst_12 = arith.constant dense<2147483647> : vector<128xi32>
    %23 = vector.multi_reduction <minsi>, %22, %cst_12 [1] : vector<128x256xi32> to vector<128xi32>
    %24 = vector.shape_cast %23 : vector<128xi32> to vector<128x1xi32>
    %c256_i32 = arith.constant 256 : i32
    %25 = arith.muli %arg1, %c256_i32 : i32
    %26 = vector.broadcast %25 : i32 to vector<128x1xi32>
    %27 = arith.addi %24, %26 : vector<128x1xi32>
    %c0_i32 = arith.constant 0 : i32
    %28 = arith.cmpi eq, %arg1, %c0_i32 : i32
    %29 = arith.extui %28 : i1 to i32
    %c0_i32_13 = arith.constant 0 : i32
    %30 = arith.cmpi ne, %29, %c0_i32_13 : i32
    scf.if %30 {
      %c0_20 = arith.constant 0 : index
      %c0_21 = arith.constant 0 : index
      %38 = vector.load %arg6[%c0_20, %c0_21] : memref<128x1xf32, #tpu.memory_space<vmem>>, vector<128x1xf32>
      tpu.vector_store %arg6[%c0_20, %c0_21], %17 {strides = array<i32>} : memref<128x1xf32, #tpu.memory_space<vmem>>, vector<128x1xf32>,
      %c0_22 = arith.constant 0 : index
      %c0_23 = arith.constant 0 : index
      %39 = vector.load %arg7[%c0_22, %c0_23] : memref<128x1xi32, #tpu.memory_space<vmem>>, vector<128x1xi32>
      tpu.vector_store %arg7[%c0_22, %c0_23], %27 {strides = array<i32>} : memref<128x1xi32, #tpu.memory_space<vmem>>, vector<128x1xi32>,
    } else {
    }
    %c0_i32_14 = arith.constant 0 : i32
    %31 = arith.cmpi sgt, %arg1, %c0_i32_14 : i32
    %32 = arith.extui %31 : i1 to i32
    %c0_i32_15 = arith.constant 0 : i32
    %33 = arith.cmpi ne, %32, %c0_i32_15 : i32
    scf.if %33 {
      %c0_20 = arith.constant 0 : index
      %c0_21 = arith.constant 0 : index
      %38 = vector.load %arg6[%c0_20, %c0_21] : memref<128x1xf32, #tpu.memory_space<vmem>>, vector<128x1xf32>
      %39 = arith.cmpf ogt, %17, %38 : vector<128x1xf32>
      %40 = arith.select %39, %17, %38 : vector<128x1xi1>, vector<128x1xf32>
      %c0_22 = arith.constant 0 : index
      %c0_23 = arith.constant 0 : index
      %41 = vector.load %arg6[%c0_22, %c0_23] : memref<128x1xf32, #tpu.memory_space<vmem>>, vector<128x1xf32>
      tpu.vector_store %arg6[%c0_22, %c0_23], %40 {strides = array<i32>} : memref<128x1xf32, #tpu.memory_space<vmem>>, vector<128x1xf32>,
      %c0_24 = arith.constant 0 : index
      %c0_25 = arith.constant 0 : index
      %42 = vector.load %arg7[%c0_24, %c0_25] : memref<128x1xi32, #tpu.memory_space<vmem>>, vector<128x1xi32>
      %43 = arith.select %39, %27, %42 : vector<128x1xi1>, vector<128x1xi32>
      %c0_26 = arith.constant 0 : index
      %c0_27 = arith.constant 0 : index
      %44 = vector.load %arg7[%c0_26, %c0_27] : memref<128x1xi32, #tpu.memory_space<vmem>>, vector<128x1xi32>
      tpu.vector_store %arg7[%c0_26, %c0_27], %43 {strides = array<i32>} : memref<128x1xi32, #tpu.memory_space<vmem>>, vector<128x1xi32>,
    } else {
    }
    %cst_16 = arith.constant dense<0xFF800000> : vector<256xf32>
    %34 = vector.multi_reduction <maximumf>, %15, %cst_16 [0] : vector<128x256xf32> to vector<256xf32>
    %35 = vector.shape_cast %34 : vector<256xf32> to vector<1x256xf32>
    %36 = vector.shape_cast %35 : vector<1x256xf32> to vector<1x1x256xf32>
    %c0_17 = arith.constant 0 : index
    %c0_18 = arith.constant 0 : index
    %c0_19 = arith.constant 0 : index
    %37 = vector.load %arg8[%c0_17, %c0_18, %c0_19] : memref<1x1x256xf32, #tpu.memory_space<vmem>>, vector<1x1x256xf32>
    tpu.vector_store %arg8[%c0_17, %c0_18, %c0_19], %36 {strides = array<i32>} : memref<1x1x256xf32, #tpu.memory_space<vmem>>, vector<1x1x256xf32>,
    return
  }
  func.func @transform_0(%arg0: i32, %arg1: i32) -> (i32, i32) {
    %c0_i32 = arith.constant 0 : i32
    %c0_i32_0 = arith.constant 0 : i32
    return %arg0, %c0_i32 : i32, i32
  }
  func.func @transform_1(%arg0: i32, %arg1: i32) -> (i32, i32) {
    %c1_i32 = arith.constant 1 : i32
    %0 = arith.addi %c1_i32, %arg1 : i32
    %c0_i32 = arith.constant 0 : i32
    %c0_i32_0 = arith.constant 0 : i32
    return %0, %c0_i32 : i32, i32
  }
  func.func @transform_2(%arg0: i32, %arg1: i32) -> (i32, i32) {
    %c0_i32 = arith.constant 0 : i32
    %c0_i32_0 = arith.constant 0 : i32
    return %arg0, %c0_i32 : i32, i32
  }
  func.func @transform_3(%arg0: i32, %arg1: i32) -> (i32, i32) {
    %c0_i32 = arith.constant 0 : i32
    %c0_i32_0 = arith.constant 0 : i32
    return %c0_i32, %arg1 : i32, i32
  }
  func.func @transform_4(%arg0: i32, %arg1: i32) -> (i32, i32) {
    %c0_i32 = arith.constant 0 : i32
    %c0_i32_0 = arith.constant 0 : i32
    return %arg0, %c0_i32 : i32, i32
  }
  func.func @transform_5(%arg0: i32, %arg1: i32) -> (i32, i32) {
    %c0_i32 = arith.constant 0 : i32
    %c0_i32_0 = arith.constant 0 : i32
    return %arg0, %c0_i32 : i32, i32
  }
  func.func @transform_6(%arg0: i32, %arg1: i32) -> (i32, i32, i32) {
    %c0_i32 = arith.constant 0 : i32
    %c0_i32_0 = arith.constant 0 : i32
    return %arg0, %c0_i32, %arg1 : i32, i32, i32
  }
}

module attributes {stable_mosaic.version = 11 : i64} {
  func.func @_upsample_kernel(%arg0: i32, %arg1: memref<128x16xf32, #tpu.memory_space<vmem>>, %arg2: memref<16x128xf32, #tpu.memory_space<vmem>>, %arg3: memref<128x128xf32, #tpu.memory_space<vmem>>) attributes {dimension_semantics = [#tpu.dimension_semantics<parallel>], iteration_bounds = array<i64: 1>, scalar_prefetch = 0 : i64, scratch_operands = 0 : i64, tpu.core_type = #tpu.core_type<tc>, window_params = [{transform_indices = @transform_0, window_bounds = array<i64: 128, 16>}, {pipeline_mode = #tpu.pipeline_mode<synchronous>, transform_indices = @transform_1, window_bounds = array<i64: 16, 128>}, {transform_indices = @transform_2, window_bounds = array<i64: 128, 128>}]} {
    %c0 = arith.constant 0 : index
    %c0_0 = arith.constant 0 : index
    %0 = vector.load %arg1[%c0, %c0_0] : memref<128x16xf32, #tpu.memory_space<vmem>>, vector<128x16xf32>
    %c0_1 = arith.constant 0 : index
    %c0_2 = arith.constant 0 : index
    %1 = vector.load %arg2[%c0_1, %c0_2] : memref<16x128xf32, #tpu.memory_space<vmem>>, vector<16x128xf32>
    %cst = arith.constant dense<0.000000e+00> : vector<128x128xf32>
    %2 = tpu.matmul %0, %1, %cst {dimension_numbers = #tpu.dot_dimension_numbers<[1], [0], [0], [1], [0, 0, 1, 1], [], []>} : vector<128x16xf32>, vector<16x128xf32>, vector<128x128xf32> -> vector<128x128xf32>
    %c0_3 = arith.constant 0 : index
    %c0_4 = arith.constant 0 : index
    %3 = vector.load %arg3[%c0_3, %c0_4] : memref<128x128xf32, #tpu.memory_space<vmem>>, vector<128x128xf32>
    tpu.vector_store %arg3[%c0_3, %c0_4], %2 {strides = array<i32>} : memref<128x128xf32, #tpu.memory_space<vmem>>, vector<128x128xf32>,
    return
  }
  func.func @transform_0(%arg0: i32) -> (i32, i32) {
    %c0_i32 = arith.constant 0 : i32
    %c0_i32_0 = arith.constant 0 : i32
    return %arg0, %c0_i32 : i32, i32
  }
  func.func @transform_1(%arg0: i32) -> (i32, i32) {
    %c0_i32 = arith.constant 0 : i32
    %c0_i32_0 = arith.constant 0 : i32
    %c0_i32_1 = arith.constant 0 : i32
    return %c0_i32, %c0_i32_0 : i32, i32
  }
  func.func @transform_2(%arg0: i32) -> (i32, i32) {
    %c0_i32 = arith.constant 0 : i32
    %c0_i32_0 = arith.constant 0 : i32
    return %arg0, %c0_i32 : i32, i32
  }
}

</mosaic_0001>

<bundles_post_ra>
// kernel: semla_forward.3
= control target key start
LH: loop header
LB: loop body
LE: loop exit
PB: predicated region body
PF: predicated region fallthrough
CT: control target
= control target key end

     0   :  { %s1468_s18 = smov 0   ;;  %s1790_s0 = inlined_call_operand.vmem [shape: bf16[512,64], index: 0, kind: input, shape index: {}]   ;;  %s1791_s1 = inlined_call_operand.vmem [shape: bf16[64,128], index: 1, kind: input, shape index: {}]   ;;  %s1792_s2 = inlined_call_operand.vmem [shape: f32[1,128], index: 2, kind: input, shape index: {}]   ;;  %s1793_s3 = inlined_call_operand.vmem [shape: f32[1,128], index: 3, kind: input, shape index: {}]   ;;  %s1794_s4 = inlined_call_operand.vmem [shape: bf16[512,128], index: 4, kind: output, shape index: {0}]   ;;  %s1795_s5 = inlined_call_operand.vmem [shape: f32[512,1], index: 5, kind: output, shape index: {1}]  }
   0x1 LB: > { %s1061_s19 = sadd.s32 4294967295, %s1436_s18   ;;  %p1065_p0 = scmp.ge.s32.totalorder %s1436_s18, 1  ;;  %s1436_s18 = sphi %s1468_s18, %s16_s18  }
   0x2   : > { %p191_p1 = scmp.lt.s32.totalorder %s1436_s18, 3 }
   0x4   : > { %p192_p2 = pnand %p1065_p0, %p191_p1 }
   0x5   : > { %v1346_v0 = vld [vmem:[%s1791_s1] sm:$0xff] (!%p192_p2)   ;;  %s1066_s22 = sshll.u32 (!%p192_p2), %s1061_s19, 5  ;;  %v1347_v1 = vld [vmem:[%s1791_s1 + $0x8] sm:$0xff] (!%p192_p2)   ;;  %v1348_v2 = vld [vmem:[%s1791_s1 + $0x10] sm:$0xff] (!%p192_p2)   ;;  %vm394_vm0 = vcmask (!%p192_p2), 523264   ;;  %v606_v20 = vlaneseq (!%p192_p2)  ;;  %vm739_vm1 = vcmask (!%p192_p2), 7168  }
   0x6   : > { %195 = sbr.rel (%p192_p2) target bundleno = 454 (0x1c6), region = 36  ;;  %p225_p3 = scmp.lt.s32.totalorder (!%p192_p2), %s1066_s22, 63  ;;  %1290 = vmatprep.subr.bf16.mxu0 (!%p192_p2), %v1346_v0  ;;  %1330 = vmatprep.subr.bf16.mxu1 (!%p192_p2), %v1346_v0  ;;  %v1349_v3 = vld [vmem:[%s1791_s1 + $0x18] sm:$0xff] (!%p192_p2)   ;;  %v604_v22 = vld [vmem:[%s1793_s3] sm:$0x1] (!%p192_p2) }
   0x7   : > { %1291 = vmatpush3.bf16.msra.mxu0 (!%p192_p2), %v1346_v0  ;;  %1334 = vmatpush3.bf16.msra.mxu1 (!%p192_p2), %v1346_v0  ;;  %v607_v21 = vshrl.u32 (!%p192_p2), %v606_v20, 7  ;;  %v772_v24 = vsub.f32 (!%p192_p2), 1.0, %v604_v22  ;;  %v1536_v25 = vld [vmem:[%s1792_s2] ss:$0 sm:$0xff] (!%p192_p2) }
   0x8   : > { %1292 = vmatprep.subr.bf16.mxu0 (!%p192_p2), %v1347_v1  ;;  %1331 = vmatprep.subr.bf16.mxu1 (!%p192_p2), %v1347_v1 }
   0x9   : > { %v608_v23 = vsub.s32 (!%p192_p2), 0, %v607_v21 }
   0xb   : > { %1293 = vmatpush3.bf16.msra.mxu0 (!%p192_p2), %v1347_v1  ;;  %1335 = vmatpush3.bf16.msra.mxu1 (!%p192_p2), %v1347_v1  ;;  %v1538_v27 = vrot.slane (!%p192_p2), %v772_v24, %v608_v23  ;;  %v1542_v33 = vrot.slane (!%p192_p2), %v604_v22, %v608_v23 }
   0xc   : > { %1294 = vmatprep.subr.bf16.mxu0 (!%p192_p2), %v1348_v2  ;;  %1332 = vmatprep.subr.bf16.mxu1 (!%p192_p2), %v1348_v2 }
   0xd   : > { %s1797_s22 = smov (!%p225_p3, %s1066_s22), 63 }
   0xe   : > { %s1067_s27 = sshll.u32 %s1797_s22, 2  ;;  %s1071_s15 = sshll.u32 %s1797_s22, 3 }
   0xf   : > { %s1496_s7 = scalar_lea.vmem %s1790_s0, %s1067_s27  ;;  %1295 = vmatpush3.bf16.msra.mxu0 %v1348_v2  ;;  %1336 = vmatpush3.bf16.msra.mxu1 %v1348_v2  ;;  %s1563_s14 = scalar_lea.vmem %s1794_s4, %s1067_s27 }
  0x10   : > { %v1350_v4 = vld [vmem:[%s1496_s7] sm:$0xff]   ;;  %1296 = vmatprep.subr.bf16.mxu0 %v1349_v3  ;;  %1333 = vmatprep.subr.bf16.mxu1 %v1349_v3  ;;  %v1352_v6 = vld [vmem:[%s1496_s7 + $0x8] sm:$0xff]   ;;  %v1354_v8 = vld [vmem:[%s1496_s7 + $0x10] sm:$0xff]   ;;  %s1721_s19 = scalar_lea.vmem %s1795_s5, %s1071_s15 }
  0x11   : > { %v1351_v5 = vld [vmem:[%s1496_s7 + $0x40] sm:$0xff]   ;;  %1298 = vmatprep.mubr.msk.bf16.mxu0 %vm394_vm0, %v1350_v4  ;;  %v1353_v7 = vld [vmem:[%s1496_s7 + $0x48] sm:$0xff]   ;;  %v1356_v9 = vld [vmem:[%s1496_s7 + $0x50] sm:$0xff]  }
  0x12   : > { %1314 = vmatprep.mubr.msk.bf16.mxu1 %vm394_vm0, %v1351_v5  ;;  %v1355_v10 = vld [vmem:[%s1496_s7 + $0x18] sm:$0xff]   ;;  %v1358_v12 = vld [vmem:[%s1496_s7 + $0x20] sm:$0xff]   ;;  %v1359_v14 = vld [vmem:[%s1496_s7 + $0x28] sm:$0xff]  }
  0x13   : > { %1297 = vmatpush3.bf16.msra.mxu0 %v1349_v3  ;;  %1337 = vmatpush3.bf16.msra.mxu1 %v1349_v3  ;;  %v1357_v11 = vld [vmem:[%s1496_s7 + $0x58] sm:$0xff]   ;;  %v1360_v13 = vld [vmem:[%s1496_s7 + $0x60] sm:$0xff]   ;;  %v1361_v15 = vld [vmem:[%s1496_s7 + $0x68] sm:$0xff]  }
  0x14   : > { %v1362_v16 = vld [vmem:[%s1496_s7 + $0x30] sm:$0xff]   ;;  %v1363_v18 = vld [vmem:[%s1496_s7 + $0x38] sm:$0xff]  }
  0x15   : > { %v1364_v17 = vld [vmem:[%s1496_s7 + $0x70] sm:$0xff]   ;;  %v1365_v19 = vld [vmem:[%s1496_s7 + $0x78] sm:$0xff]  }
  0x16   : > { %1299 = vmatmul.mubr.msk.bf16.vlgmr.msra.gmra.mrb[0].mxu0 %vm394_vm0, %v1352_v6  ;;  %1315 = vmatmul.mubr.msk.bf16.vlgmr.msra.gmra.mrb[0].mxu1 %vm394_vm0, %v1353_v7 }
  0x17   : > { %1302 = vmatprep.mubr.msk.bf16.mxu0 %vm394_vm0, %v1354_v8  ;;  %1318 = vmatprep.mubr.msk.bf16.mxu1 %vm394_vm0, %v1356_v9 }
  0x1e   : > { %1303 = vmatmul.mubr.msk.bf16.gmra.mrb[4].mxu0 %vm394_vm0, %v1355_v10  ;;  %1319 = vmatmul.mubr.msk.bf16.gmra.mrb[4].mxu1 %vm394_vm0, %v1357_v11 }
  0x1f   : > { %1306 = vmatprep.mubr.msk.bf16.mxu0 %vm394_vm0, %v1358_v12  ;;  %1322 = vmatprep.mubr.msk.bf16.mxu1 %vm394_vm0, %v1360_v13 }
  0x26   : > { %1307 = vmatmul.mubr.msk.bf16.gmra.mrb[8].mxu0 %vm394_vm0, %v1359_v14  ;;  %1323 = vmatmul.mubr.msk.bf16.gmra.mrb[8].mxu1 %vm394_vm0, %v1361_v15 }
  0x27   : > { %1310 = vmatprep.mubr.msk.bf16.mxu0 %vm394_vm0, %v1362_v16  ;;  %1326 = vmatprep.mubr.msk.bf16.mxu1 %vm394_vm0, %v1364_v17 }
  0x2e   : > { %1311 = vmatmul.mubr.msk.bf16.gmra.mrb[12].mxu0 %vm394_vm0, %v1363_v18  ;;  %1327 = vmatmul.mubr.msk.bf16.gmra.mrb[12].mxu1 %vm394_vm0, %v1365_v19 }
  0xe9   : > { %v1300_v26 = vpop.f32.mrb[0].mxu0  ;;  %v1316_v28 = vpop.f32.mrb[0].mxu1 }
  0xea   : > { %v486_v29 = vadd.f32 %v1300_v26, %v1536_v25  ;;  %v550_v30 = vadd.f32 %v1316_v28, %v1536_v25  ;;  %v477_v31 = vpop.f32.mrb[1].mxu0  ;;  %v541_v32 = vpop.f32.mrb[1].mxu1 }
  0xeb   : > { %v478_v34 = vadd.f32 %v1536_v25, %v477_v31  ;;  %v542_v35 = vadd.f32 %v1536_v25, %v541_v32  ;;  %v1301_v36 = vpop.f32.mrb[2].mxu0  ;;  %v1317_v37 = vpop.f32.mrb[2].mxu1 }
  0xec   : > { %v489_v38 = vadd.f32 %v1301_v36, %v1536_v25  ;;  %v553_v39 = vadd.f32 %v1317_v37, %v1536_v25  ;;  %v480_v40 = vpop.f32.mrb[3].mxu0  ;;  %v544_v41 = vpop.f32.mrb[3].mxu1  ;;  %v781_v42 = vmul.f32 %v1538_v27, %v486_v29  ;;  %v797_v43 = vmul.f32 %v1538_v27, %v550_v30 }
  0xed   : > { %v481_v44 = vadd.f32 %v1536_v25, %v480_v40  ;;  %v545_v45 = vadd.f32 %v1536_v25, %v544_v41  ;;  %v629_v48 = vmul.f32 %v1542_v33, %v550_v30  ;;  %v613_v49 = vmul.f32 %v1542_v33, %v486_v29 }
  0xee   : > { %v782_v46 = vmul.f32 %v1538_v27, %v489_v38  ;;  %v798_v47 = vmul.f32 %v1538_v27, %v553_v39  ;;  %v779_v50 = vmul.f32 %v1538_v27, %v478_v34  ;;  %v795_v51 = vmul.f32 %v1538_v27, %v542_v35 }
  0xef   : > { %v780_v52 = vmul.f32 %v1538_v27, %v481_v44  ;;  %v796_v53 = vmul.f32 %v1538_v27, %v545_v45  ;;  %679 = vadd.xlane.f32.xlu0 %v629_v48  ;;  %647 = vadd.xlane.f32.xlu1 %v613_v49  ;;  %v614_v60 = vmul.f32 %v1542_v33, %v489_v38 }
  0xf0   : > { %v1183_v54 = vpack.c.bf16 %v782_v46, %v781_v42  ;;  %v1223_v55 = vpack.c.bf16 %v798_v47, %v797_v43  ;;  %v611_v61 = vmul.f32 %v1542_v33, %v478_v34  ;;  %v630_v7 = vmul.f32 %v1542_v33, %v553_v39 }
  0xf1   : > { %v1178_v56 = vpack.c.bf16 %v780_v52, %v779_v50  ;;  %v1218_v57 = vpack.c.bf16 %v796_v53, %v795_v51  ;;  %v1304_v58 = vpop.f32.mrb[4].mxu0  ;;  %v1320_v59 = vpop.f32.mrb[4].mxu1  ;;  %v627_v16 = vmul.f32 %v1542_v33, %v542_v35  ;;  %v628_v26 = vmul.f32 %v1542_v33, %v545_v45 }
  0xf2   : > { %1255 = vst [vmem:[%s1563_s14 + $0x8] sm:$0xff] %v1183_v54   ;;  %1263 = vst [vmem:[%s1563_s14 + $0x48] sm:$0xff] %v1223_v55   ;;  %v502_v62 = vadd.f32 %v1304_v58, %v1536_v25  ;;  %v493_v63 = vpop.f32.mrb[5].mxu0  ;;  %v1573_v0 = vadd.f32 %v1320_v59, %v1536_v25  ;;  %v557_v1 = vpop.f32.mrb[5].mxu1  ;;  %v612_v30 = vmul.f32 %v1542_v33, %v481_v44 }
  0xf3   : > { %1179 = vst [vmem:[%s1563_s14] sm:$0xff] %v1178_v56   ;;  %1262 = vst [vmem:[%s1563_s14 + $0x40] sm:$0xff] %v1218_v57   ;;  %v1578_v2 = vadd.f32 %v1536_v25, %v493_v63  ;;  %v1305_v3 = vpop.f32.mrb[6].mxu0  ;;  %v1581_v4 = vadd.f32 %v1536_v25, %v557_v1  ;;  %v1321_v5 = vpop.f32.mrb[6].mxu1  ;;  %649 = vadd.xlane.f32.xlu1 %v614_v60  ;;  %643 = vadd.xlane.f32.xlu0 %v611_v61 }
  0xf4   : > { %v785_v6 = vmul.f32 %v1538_v27, %v502_v62  ;;  %v505_v8 = vadd.f32 %v1305_v3, %v1536_v25  ;;  %v496_v9 = vpop.f32.mrb[7].mxu0  ;;  %v560_v10 = vpop.f32.mrb[7].mxu1  ;;  %v801_v13 = vmul.f32 %v1538_v27, %v1573_v0  ;;  %v569_v14 = vadd.f32 %v1321_v5, %v1536_v25 }
  0xf5   : > { %v783_v11 = vmul.f32 %v1538_v27, %v1578_v2  ;;  %v1589_v12 = vadd.f32 %v1536_v25, %v496_v9  ;;  %v799_v17 = vmul.f32 %v1538_v27, %v1581_v4  ;;  %v1599_v18 = vadd.f32 %v1536_v25, %v560_v10 }
  0xf6   : > { %v786_v15 = vmul.f32 %v1538_v27, %v505_v8  ;;  %v802_v20 = vmul.f32 %v1538_v27, %v569_v14  ;;  %v618_v41 = vmul.f32 %v1542_v33, %v505_v8  ;;  %v617_v50 = vmul.f32 %v1542_v33, %v502_v62 }
  0xf7   : > { %v784_v19 = vmul.f32 %v1538_v27, %v1589_v12  ;;  %681 = vadd.xlane.f32.xlu1 %v630_v7  ;;  %675 = vadd.xlane.f32.xlu0 %v627_v16  ;;  %v800_v22 = vmul.f32 %v1538_v27, %v1599_v18  ;;  %v634_v58 = vmul.f32 %v1542_v33, %v569_v14 }
  0xf8   : > { %v1193_v21 = vpack.c.bf16 %v786_v15, %v785_v6  ;;  %v1233_v24 = vpack.c.bf16 %v802_v20, %v801_v13  ;;  %v633_v63 = vmul.f32 %v1542_v33, %v1573_v0  ;;  %v616_v0 = vmul.f32 %v1542_v33, %v1589_v12 }
  0xf9   : > { %v1188_v23 = vpack.c.bf16 %v784_v19, %v783_v11  ;;  %v1308_v28 = vpop.f32.mrb[8].mxu0  ;;  %v1324_v29 = vpop.f32.mrb[8].mxu1  ;;  %v1228_v31 = vpack.c.bf16 %v800_v22, %v799_v17  ;;  %v615_v12 = vmul.f32 %v1542_v33, %v1578_v2 }
  0xfa   : > { %1257 = vst [vmem:[%s1563_s14 + $0x18] sm:$0xff] %v1193_v21   ;;  %v1610_v32 = vadd.f32 %v1308_v28, %v1536_v25  ;;  %v509_v34 = vpop.f32.mrb[9].mxu0  ;;  %v1613_v35 = vadd.f32 %v1324_v29, %v1536_v25  ;;  %v573_v36 = vpop.f32.mrb[9].mxu1  ;;  %1265 = vst [vmem:[%s1563_s14 + $0x58] sm:$0xff] %v1233_v24  }
  0xfb   : > { %1256 = vst [vmem:[%s1563_s14 + $0x10] sm:$0xff] %v1188_v23   ;;  %v1618_v37 = vadd.f32 %v1536_v25, %v509_v34  ;;  %v1309_v38 = vpop.f32.mrb[10].mxu0  ;;  %v1621_v39 = vadd.f32 %v1536_v25, %v573_v36  ;;  %v1325_v40 = vpop.f32.mrb[10].mxu1  ;;  %677 = vadd.xlane.f32.xlu1 %v628_v26  ;;  %645 = vadd.xlane.f32.xlu0 %v612_v30  ;;  %1264 = vst [vmem:[%s1563_s14 + $0x50] sm:$0xff] %v1228_v31  }
  0xfc   : > { %v789_v42 = vmul.f32 %v1538_v27, %v1610_v32  ;;  %v1628_v43 = vadd.f32 %v1309_v38, %v1536_v25  ;;  %v512_v44 = vpop.f32.mrb[11].mxu0  ;;  %v576_v45 = vpop.f32.mrb[11].mxu1  ;;  %v805_v48 = vmul.f32 %v1538_v27, %v1613_v35  ;;  %v1638_v49 = vadd.f32 %v1325_v40, %v1536_v25 }
  0xfd   : > { %v787_v46 = vmul.f32 %v1538_v27, %v1618_v37  ;;  %v1633_v47 = vadd.f32 %v1536_v25, %v512_v44  ;;  %v803_v52 = vmul.f32 %v1538_v27, %v1621_v39  ;;  %v1646_v53 = vadd.f32 %v1536_v25, %v576_v45 }
  0xfe   : > { %v790_v51 = vmul.f32 %v1538_v27, %v1628_v43  ;;  %v806_v55 = vmul.f32 %v1538_v27, %v1638_v49  ;;  %v632_v34 = vmul.f32 %v1542_v33, %v1599_v18  ;;  %v631_v36 = vmul.f32 %v1542_v33, %v1581_v4 }
  0xff   : > { %v788_v54 = vmul.f32 %v1538_v27, %v1633_v47  ;;  %657 = vadd.xlane.f32.xlu1 %v618_v41  ;;  %655 = vadd.xlane.f32.xlu0 %v617_v50  ;;  %v804_v57 = vmul.f32 %v1538_v27, %v1646_v53  ;;  %v622_v38 = vmul.f32 %v1542_v33, %v1628_v43 }
 0x100   : > { %v1203_v56 = vpack.c.bf16 %v790_v51, %v789_v42  ;;  %v1243_v60 = vpack.c.bf16 %v806_v55, %v805_v48  ;;  %v638_v18 = vmul.f32 %v1542_v33, %v1638_v49  ;;  %v637_v4 = vmul.f32 %v1542_v33, %v1613_v35 }
 0x101   : > { %v1198_v59 = vpack.c.bf16 %v788_v54, %v787_v46  ;;  %v1312_v61 = vpop.f32.mrb[12].mxu0  ;;  %v1328_v62 = vpop.f32.mrb[12].mxu1  ;;  %v1238_v1 = vpack.c.bf16 %v804_v57, %v803_v52  ;;  %v620_v40 = vmul.f32 %v1542_v33, %v1633_v47  ;;  %v619_v41 = vmul.f32 %v1542_v33, %v1618_v37 }
 0x102   : > { %1259 = vst [vmem:[%s1563_s14 + $0x28] sm:$0xff] %v1203_v56   ;;  %v534_v3 = vadd.f32 %v1312_v61, %v1536_v25  ;;  %v525_v5 = vpop.f32.mrb[13].mxu0  ;;  %v1660_v6 = vadd.f32 %v1328_v62, %v1536_v25  ;;  %v589_v7 = vpop.f32.mrb[13].mxu1  ;;  %1267 = vst [vmem:[%s1563_s14 + $0x68] sm:$0xff] %v1243_v60   ;;  %v635_v42 = vmul.f32 %v1542_v33, %v1621_v39 }
 0x103   : > { %1258 = vst [vmem:[%s1563_s14 + $0x20] sm:$0xff] %v1198_v59   ;;  %v526_v8 = vadd.f32 %v1536_v25, %v525_v5  ;;  %v1313_v9 = vpop.f32.mrb[14].mxu0  ;;  %v590_v10 = vadd.f32 %v1536_v25, %v589_v7  ;;  %v1329_v11 = vpop.f32.mrb[14].mxu1  ;;  %689 = vadd.xlane.f32.xlu1 %v634_v58  ;;  %687 = vadd.xlane.f32.xlu0 %v633_v63  ;;  %1266 = vst [vmem:[%s1563_s14 + $0x60] sm:$0xff] %v1238_v1  }
 0x104   : > { %v793_v13 = vmul.f32 %v1538_v27, %v534_v3  ;;  %v537_v14 = vadd.f32 %v1313_v9, %v1536_v25  ;;  %v528_v15 = vpop.f32.mrb[15].mxu0  ;;  %v592_v16 = vpop.f32.mrb[15].mxu1  ;;  %v809_v20 = vmul.f32 %v1538_v27, %v1660_v6  ;;  %v601_v21 = vadd.f32 %v1329_v11, %v1536_v25 }
 0x105   : > { %v791_v17 = vmul.f32 %v1538_v27, %v526_v8  ;;  %v529_v19 = vadd.f32 %v1536_v25, %v528_v15  ;;  %v807_v23 = vmul.f32 %v1538_v27, %v590_v10  ;;  %v593_v24 = vadd.f32 %v1536_v25, %v592_v16 }
 0x106   : > { %v794_v22 = vmul.f32 %v1538_v27, %v537_v14  ;;  %v810_v28 = vmul.f32 %v1538_v27, %v601_v21  ;;  %v626_v35 = vmul.f32 %v1542_v33, %v537_v14  ;;  %v625_v43 = vmul.f32 %v1542_v33, %v534_v3 }
 0x107   : > { %v792_v26 = vmul.f32 %v1538_v27, %v529_v19  ;;  %653 = vadd.xlane.f32.xlu1 %v616_v0  ;;  %651 = vadd.xlane.f32.xlu0 %v615_v12  ;;  %v808_v30 = vmul.f32 %v1538_v27, %v593_v24  ;;  %v621_v27 = vmul.f32 %v1542_v33, %v1610_v32 }
 0x108   : > { %v1213_v29 = vpack.c.bf16 %v794_v22, %v793_v13  ;;  %v1253_v2 = vpack.c.bf16 %v810_v28, %v809_v20  ;;  %v636_v32 = vmul.f32 %v1542_v33, %v1646_v53  ;;  %v624_v44 = vmul.f32 %v1542_v33, %v529_v19 }
 0x109   : > { %v1208_v31 = vpack.c.bf16 %v792_v26, %v791_v17  ;;  %v1248_v25 = vpack.c.bf16 %v808_v30, %v807_v23  ;;  %v623_v37 = vmul.f32 %v1542_v33, %v526_v8  ;;  %v640_v45 = vmul.f32 %v1542_v33, %v593_v24 }
 0x10a   : > { %1261 = vst [vmem:[%s1563_s14 + $0x38] sm:$0xff] %v1213_v29   ;;  %1269 = vst [vmem:[%s1563_s14 + $0x78] sm:$0xff] %v1253_v2   ;;  %v639_v46 = vmul.f32 %v1542_v33, %v590_v10  ;;  %v642_v39 = vmul.f32 %v1542_v33, %v601_v21  ;;  %v641_v47 = vmul.f32 %v1542_v33, %v1660_v6 }
 0x10b   : > { %1260 = vst [vmem:[%s1563_s14 + $0x30] sm:$0xff] %v1208_v31   ;;  %685 = vadd.xlane.f32.xlu1 %v632_v34  ;;  %683 = vadd.xlane.f32.xlu0 %v631_v36  ;;  %1268 = vst [vmem:[%s1563_s14 + $0x70] sm:$0xff] %v1248_v25  }
 0x10f   : > { %665 = vadd.xlane.f32.xlu1 %v622_v38  ;;  %663 = vadd.xlane.f32.xlu0 %v621_v27 }
 0x113   : > { %697 = vadd.xlane.f32.xlu1 %v638_v18  ;;  %695 = vadd.xlane.f32.xlu0 %v637_v4 }
 0x117   : > { %661 = vadd.xlane.f32.xlu1 %v620_v40  ;;  %659 = vadd.xlane.f32.xlu0 %v619_v41 }
 0x11b   : > { %693 = vadd.xlane.f32.xlu1 %v636_v32  ;;  %691 = vadd.xlane.f32.xlu0 %v635_v42 }
 0x11f   : > { %673 = vadd.xlane.f32.xlu1 %v626_v35  ;;  %671 = vadd.xlane.f32.xlu0 %v625_v43 }
 0x123   : > { %669 = vadd.xlane.f32.xlu1 %v624_v44  ;;  %667 = vadd.xlane.f32.xlu0 %v623_v37 }
 0x127   : > { %701 = vadd.xlane.f32.xlu1 %v640_v45  ;;  %699 = vadd.xlane.f32.xlu0 %v639_v46 }
 0x12b   : > { %705 = vadd.xlane.f32.xlu1 %v642_v39  ;;  %703 = vadd.xlane.f32.xlu0 %v641_v47 }
 0x17c   : > { %v680_v48 = vpop.xlane.xlu0 %679  ;;  %v648_v49 = vpop.xlane.xlu1 %647 }
 0x17d   : > { %1366 = vtanh.f32 %v680_v48 }
 0x17e   : > { %1368 = vtanh.f32 %v648_v49 }
 0x180   : > { %v650_v50 = vpop.xlane.xlu1 %649  ;;  %v644_v51 = vpop.xlane.xlu0 %643 }
 0x181   : > { %1370 = vtanh.f32 %v650_v50 }
 0x182   : > { %1372 = vtanh.f32 %v644_v51 }
 0x184   : > { %v682_v52 = vpop.xlane.xlu1 %681  ;;  %v676_v53 = vpop.xlane.xlu0 %675 }
 0x185   : > { %1374 = vtanh.f32 %v682_v52 }
 0x186   : > { %1376 = vtanh.f32 %v676_v53 }
 0x187   : > { %v1367_v33 = vpop.eup %1366 }
 0x188   : > { %v1369_v54 = vpop.eup %1368  ;;  %758 = vst.msk [vmem:[%s1721_s19 + $0x90] sm:$0xff] %vm739_vm1, %v1367_v33  ;;  %v678_v55 = vpop.xlane.xlu1 %677 }
 0x189   : > { %v646_v56 = vpop.xlane.xlu0 %645  ;;  %742 = vst.msk [vmem:[%s1721_s19 + $0x10] sm:$0xff] %vm739_vm1, %v1369_v54  ;;  %1378 = vtanh.f32 %v678_v55 }
 0x18a   : > { %1380 = vtanh.f32 %v646_v56 }
 0x18b   : > { %v1371_v57 = vpop.eup %1370 }
 0x18c   : > { %v1373_v58 = vpop.eup %1372  ;;  %743 = vst.msk [vmem:[%s1721_s19 + $0x18] sm:$0xff] %vm739_vm1, %v1371_v57  ;;  %v658_v59 = vpop.xlane.xlu1 %657 }
 0x18d   : > { %v656_v60 = vpop.xlane.xlu0 %655  ;;  %740 = vst.msk [vmem:[%s1721_s19] sm:$0xff] %vm739_vm1, %v1373_v58  ;;  %1382 = vtanh.f32 %v658_v59 }
 0x18e   : > { %1384 = vtanh.f32 %v656_v60 }
 0x18f   : > { %v1375_v61 = vpop.eup %1374 }
 0x190   : > { %v1377_v62 = vpop.eup %1376  ;;  %759 = vst.msk [vmem:[%s1721_s19 + $0x98] sm:$0xff] %vm739_vm1, %v1375_v61  ;;  %v690_v63 = vpop.xlane.xlu1 %689 }
 0x191   : > { %v688_v1 = vpop.xlane.xlu0 %687  ;;  %756 = vst.msk [vmem:[%s1721_s19 + $0x80] sm:$0xff] %vm739_vm1, %v1377_v62  ;;  %1386 = vtanh.f32 %v690_v63 }
 0x192   : > { %1388 = vtanh.f32 %v688_v1 }
 0x193   : > { %v1379_v3 = vpop.eup %1378 }
 0x194   : > { %v1381_v5 = vpop.eup %1380  ;;  %757 = vst.msk [vmem:[%s1721_s19 + $0x88] sm:$0xff] %vm739_vm1, %v1379_v3  ;;  %v654_v6 = vpop.xlane.xlu1 %653 }
 0x195   : > { %v652_v7 = vpop.xlane.xlu0 %651  ;;  %741 = vst.msk [vmem:[%s1721_s19 + $0x8] sm:$0xff] %vm739_vm1, %v1381_v5  ;;  %1390 = vtanh.f32 %v654_v6 }
 0x196   : > { %1392 = vtanh.f32 %v652_v7 }
 0x197   : > { %v1383_v8 = vpop.eup %1382 }
 0x198   : > { %v1385_v9 = vpop.eup %1384  ;;  %747 = vst.msk [vmem:[%s1721_s19 + $0x38] sm:$0xff] %vm739_vm1, %v1383_v8  ;;  %v686_v10 = vpop.xlane.xlu1 %685 }
 0x199   : > { %v684_v11 = vpop.xlane.xlu0 %683  ;;  %746 = vst.msk [vmem:[%s1721_s19 + $0x30] sm:$0xff] %vm739_vm1, %v1385_v9  ;;  %1394 = vtanh.f32 %v686_v10 }
 0x19a   : > { %1396 = vtanh.f32 %v684_v11 }
 0x19b   : > { %v1387_v0 = vpop.eup %1386 }
 0x19c   : > { %v1389_v13 = vpop.eup %1388  ;;  %763 = vst.msk [vmem:[%s1721_s19 + $0xb8] sm:$0xff] %vm739_vm1, %v1387_v0  ;;  %v666_v14 = vpop.xlane.xlu1 %665 }
 0x19d   : > { %v664_v15 = vpop.xlane.xlu0 %663  ;;  %762 = vst.msk [vmem:[%s1721_s19 + $0xb0] sm:$0xff] %vm739_vm1, %v1389_v13  ;;  %1398 = vtanh.f32 %v666_v14 }
 0x19e   : > { %1400 = vtanh.f32 %v664_v15 }
 0x19f   : > { %v1391_v16 = vpop.eup %1390 }
 0x1a0   : > { %v1393_v17 = vpop.eup %1392  ;;  %745 = vst.msk [vmem:[%s1721_s19 + $0x28] sm:$0xff] %vm739_vm1, %v1391_v16  ;;  %v698_v19 = vpop.xlane.xlu1 %697 }
 0x1a1   : > { %v696_v20 = vpop.xlane.xlu0 %695  ;;  %744 = vst.msk [vmem:[%s1721_s19 + $0x20] sm:$0xff] %vm739_vm1, %v1393_v17  ;;  %1402 = vtanh.f32 %v698_v19 }
 0x1a2   : > { %1404 = vtanh.f32 %v696_v20 }
 0x1a3   : > { %v1395_v21 = vpop.eup %1394 }
 0x1a4   : > { %v1397_v12 = vpop.eup %1396  ;;  %761 = vst.msk [vmem:[%s1721_s19 + $0xa8] sm:$0xff] %vm739_vm1, %v1395_v21  ;;  %v662_v22 = vpop.xlane.xlu1 %661 }
 0x1a5   : > { %v660_v23 = vpop.xlane.xlu0 %659  ;;  %760 = vst.msk [vmem:[%s1721_s19 + $0xa0] sm:$0xff] %vm739_vm1, %v1397_v12  ;;  %1406 = vtanh.f32 %v662_v22 }
 0x1a6   : > { %1408 = vtanh.f32 %v660_v23 }
 0x1a7   : > { %v1399_v24 = vpop.eup %1398 }
 0x1a8   : > { %v1401_v26 = vpop.eup %1400  ;;  %751 = vst.msk [vmem:[%s1721_s19 + $0x58] sm:$0xff] %vm739_vm1, %v1399_v24  ;;  %v694_v28 = vpop.xlane.xlu1 %693 }
 0x1a9   : > { %v692_v29 = vpop.xlane.xlu0 %691  ;;  %750 = vst.msk [vmem:[%s1721_s19 + $0x50] sm:$0xff] %vm739_vm1, %v1401_v26  ;;  %1410 = vtanh.f32 %v694_v28 }
 0x1aa   : > { %1412 = vtanh.f32 %v692_v29 }
 0x1ab   : > { %v1403_v30 = vpop.eup %1402 }
 0x1ac   : > { %v1405_v31 = vpop.eup %1404  ;;  %767 = vst.msk [vmem:[%s1721_s19 + $0xd8] sm:$0xff] %vm739_vm1, %v1403_v30  ;;  %v674_v2 = vpop.xlane.xlu1 %673 }
 0x1ad   : > { %v672_v34 = vpop.xlane.xlu0 %671  ;;  %766 = vst.msk [vmem:[%s1721_s19 + $0xd0] sm:$0xff] %vm739_vm1, %v1405_v31  ;;  %1414 = vtanh.f32 %v674_v2 }
 0x1ae   : > { %1416 = vtanh.f32 %v672_v34 }
 0x1af   : > { %v1407_v36 = vpop.eup %1406 }
 0x1b0   : > { %v1409_v25 = vpop.eup %1408  ;;  %749 = vst.msk [vmem:[%s1721_s19 + $0x48] sm:$0xff] %vm739_vm1, %v1407_v36  ;;  %v670_v38 = vpop.xlane.xlu1 %669 }
 0x1b1   : > { %v668_v27 = vpop.xlane.xlu0 %667  ;;  %748 = vst.msk [vmem:[%s1721_s19 + $0x40] sm:$0xff] %vm739_vm1, %v1409_v25  ;;  %1418 = vtanh.f32 %v670_v38 }
 0x1b2   : > { %1420 = vtanh.f32 %v668_v27 }
 0x1b3   : > { %v1411_v18 = vpop.eup %1410 }
 0x1b4   : > { %v1413_v4 = vpop.eup %1412  ;;  %765 = vst.msk [vmem:[%s1721_s19 + $0xc8] sm:$0xff] %vm739_vm1, %v1411_v18  ;;  %v702_v40 = vpop.xlane.xlu1 %701 }
 0x1b5   : > { %v700_v41 = vpop.xlane.xlu0 %699  ;;  %764 = vst.msk [vmem:[%s1721_s19 + $0xc0] sm:$0xff] %vm739_vm1, %v1413_v4  ;;  %1422 = vtanh.f32 %v702_v40 }
 0x1b6   : > { %1424 = vtanh.f32 %v700_v41 }
 0x1b7   : > { %v1415_v32 = vpop.eup %1414 }
 0x1b8   : > { %v1417_v42 = vpop.eup %1416  ;;  %755 = vst.msk [vmem:[%s1721_s19 + $0x78] sm:$0xff] %vm739_vm1, %v1415_v32  ;;  %v706_v35 = vpop.xlane.xlu1 %705 }
 0x1b9   : > { %v704_v43 = vpop.xlane.xlu0 %703  ;;  %754 = vst.msk [vmem:[%s1721_s19 + $0x70] sm:$0xff] %vm739_vm1, %v1417_v42  ;;  %1426 = vtanh.f32 %v706_v35 }
 0x1ba   : > { %1428 = vtanh.f32 %v704_v43 }
 0x1bb   : > { %v1419_v44 = vpop.eup %1418 }
 0x1bc   : > { %v1421_v37 = vpop.eup %1420  ;;  %753 = vst.msk [vmem:[%s1721_s19 + $0x68] sm:$0xff] %vm739_vm1, %v1419_v44 }
 0x1bd   : > { %752 = vst.msk [vmem:[%s1721_s19 + $0x60] sm:$0xff] %vm739_vm1, %v1421_v37 }
 0x1bf   : > { %v1423_v45 = vpop.eup %1422 }
 0x1c0   : > { %v1425_v46 = vpop.eup %1424  ;;  %769 = vst.msk [vmem:[%s1721_s19 + $0xe8] sm:$0xff] %vm739_vm1, %v1423_v45 }
 0x1c1   : > { %768 = vst.msk [vmem:[%s1721_s19 + $0xe0] sm:$0xff] %vm739_vm1, %v1425_v46 }
 0x1c3   : > { %v1427_v39 = vpop.eup %1426 }
 0x1c4   : > { %v1429_v47 = vpop.eup %1428  ;;  %771 = vst.msk [vmem:[%s1721_s19 + $0xf8] sm:$0xff] %vm739_vm1, %v1427_v39 }
 0x1c5   : > { %770 = vst.msk [vmem:[%s1721_s19 + $0xf0] sm:$0xff] %vm739_vm1, %v1429_v47 }
 0x1c6 PF: > { %s16_s18 = sadd.s32 1, %s1436_s18  }
 0x1c7   : > { %p13_p4 = scmp.ge.s32.totalorder %s16_s18, 4  }
 0x1c9   :  { %15 = sbr.rel (!%p13_p4) target bundleno = 1 (0x1), region = 78 }

// kernel: semla_forward.4
= control target key start
LH: loop header
LB: loop body
LE: loop exit
PB: predicated region body
PF: predicated region fallthrough
CT: control target
= control target key end

     0   :  { %s1924_s21 = smov 0   ;;  %s1926_s22 = smov 0   ;;  %s2773_s0 = inlined_call_operand.vmem [shape: bf16[512,128], index: 0, kind: input, shape index: {}, may-alias: {0,1}]   ;;  %s2774_s1 = inlined_call_operand.vmem [shape: bf16[512,128], index: 1, kind: input, shape index: {}, may-alias: {0,1}]   ;;  %s2775_s2 = inlined_call_operand.vmem [shape: f32[512,1], index: 2, kind: input, shape index: {}]   ;;  %s2776_s3 = inlined_call_operand.vmem [shape: f32[1,256], index: 3, kind: input, shape index: {}]   ;;  %s2777_s4 = inlined_call_operand.vmem [shape: f32[256,1], index: 4, kind: output, shape index: {0}]   ;;  %s2778_s5 = inlined_call_operand.vmem [shape: s32[256,1], index: 5, kind: output, shape index: {1}]   ;;  %s2779_s6 = inlined_call_operand.vmem [shape: f32[2,1,256], index: 6, kind: output, shape index: {2}]  }
   0x1   :  { %s1928_s23 = smov 0  }
   0x2 LB: > { %s29_s24 = sadd.s32 1, %s1881_s22  ;;  %p1695_p0 = scmp.ge.s32.totalorder %s1885_s23, 1  ;;  %s1885_s23 = sphi %s1928_s23, %s17_s23   ;;  %s1881_s22 = sphi %s1926_s22, %s2809_s22   ;;  %s1877_s21 = sphi %s1924_s21, %s2808_s21  }
   0x3   : > { %p31_p1 = scmp.ge.s32.totalorder %s29_s24, 2  ;;  %p268_p2 = scmp.lt.s32.totalorder %s1885_s23, 3 }
   0x5   : > { %s2811_s24 = smov (%p31_p1, %s29_s24), 0  ;;  %p269_p3 = pnand %p1695_p0, %p268_p2 }
   0x6   : > { %v1839_v0 = vld [vmem:[%s2774_s1 + $0xc0] sm:$0xff] (!%p269_p3)   ;;  %s1948_s27 = sshll.u32 (!%p269_p3), %s1877_s21, 4  ;;  %v1841_v2 = vld [vmem:[%s2774_s1 + $0xc8] sm:$0xff] (!%p269_p3)   ;;  %v1887_v3 = vmov (!%p269_p3), 0   ;;  %v1843_v5 = vld [vmem:[%s2774_s1 + $0xd0] sm:$0xff] (!%p269_p3)   ;;  %v825_v59 = vlaneseq (!%p269_p3)  ;;  %p364_p5 = scmp.lt.s32.totalorder (!%p269_p3), %s1877_s21, 1 }
   0x7   : > { %272 = sbr.rel (%p269_p3) target bundleno = 767 (0x2ff), region = 36  ;;  %v1840_v1 = vld [vmem:[%s2774_s1 + $0x80] sm:$0xff] (!%p269_p3)   ;;  %p327_p4 = scmp.lt.s32.totalorder (!%p269_p3), %s1948_s27, 63  ;;  %1763 = vmatprep.subr.bf16.mxu0 (!%p269_p3), %v1839_v0  ;;  %1795 = vmatprep.subr.bf16.mxu1 (!%p269_p3), %v1839_v0  ;;  %v1842_v4 = vld [vmem:[%s2774_s1 + $0x88] sm:$0xff] (!%p269_p3)   ;;  %v1844_v6 = vld [vmem:[%s2774_s1 + $0x90] sm:$0xff] (!%p269_p3)  }
   0x8   : > { %1764 = vmatpush3.bf16.xpose.msra.mxu0 (!%p269_p3), %v1840_v1  ;;  %1803 = vmatpush3.bf16.xpose.msra.mxu1 (!%p269_p3), %v1840_v1  ;;  %v1845_v7 = vld [vmem:[%s2774_s1 + $0xd8] sm:$0xff] (!%p269_p3)   ;;  %v1847_v11 = vld [vmem:[%s2774_s1 + $0xe0] sm:$0xff] (!%p269_p3)   ;;  %v1849_v23 = vld [vmem:[%s2774_s1 + $0xe8] sm:$0xff] (!%p269_p3)   ;;  %v2065_v63 = vshrl.u32 (!%p269_p3), %v825_v59, 7  ;;  %p352_p6 = scmp.lt.s32.totalorder (!%p269_p3), %s1948_s27, 31 }
   0x9   : > { %1765 = vmatprep.subr.bf16.mxu0 (!%p269_p3), %v1841_v2  ;;  %1796 = vmatprep.subr.bf16.mxu1 (!%p269_p3), %v1841_v2  ;;  %v1846_v10 = vld [vmem:[%s2774_s1 + $0x98] sm:$0xff] (!%p269_p3)   ;;  %v1848_v22 = vld [vmem:[%s2774_s1 + $0xa0] sm:$0xff] (!%p269_p3)   ;;  %v1850_v32 = vld [vmem:[%s2774_s1 + $0xa8] sm:$0xff] (!%p269_p3)  }
   0xa   : > { %1837 = vset.pattern.permute.xlu0 (!%p269_p3), %v1887_v3  ;;  %1838 = vset.pattern.permute.xlu1 (!%p269_p3), %v1887_v3  ;;  %v1851_v33 = vld [vmem:[%s2774_s1 + $0xf0] sm:$0xff] (!%p269_p3)   ;;  %v1853_v43 = vld [vmem:[%s2774_s1 + $0xf8] sm:$0xff] (!%p269_p3)   ;;  %v742_v62 = vld [vmem:[%s2776_s3] sm:$0x3] (!%p269_p3)  ;;  %v827_v2 = vsub.s32 (!%p269_p3), 0, %v2065_v63 }
   0xb   : > { %v1852_v42 = vld [vmem:[%s2774_s1 + $0xb0] sm:$0xff] (!%p269_p3)   ;;  %v1854_v50 = vld [vmem:[%s2774_s1 + $0xb8] sm:$0xff] (!%p269_p3)  }
   0xe   : > { %s328_s8 = scalar_select %p327_p4, %s1948_s27, 63 }
   0xf   : > { %s2813_s21 = smov (!%p364_p5, %s1877_s21), 1  ;;  %s2815_s27 = smov (!%p352_p6, %s1948_s27), 31 }
  0x10   : > { %s1697_s13 = sshll.u32 %s328_s8, 2  ;;  %1766 = vmatpush3.bf16.xpose.msra.mxu0 %v1842_v4  ;;  %1804 = vmatpush3.bf16.xpose.msra.mxu1 %v1842_v4  ;;  %s1699_s25 = sshll.u32 %s328_s8, 3 }
  0x11   : > { %1767 = vmatprep.subr.bf16.mxu0 %v1843_v5  ;;  %1797 = vmatprep.subr.bf16.mxu1 %v1843_v5  ;;  %s1969_s16 = scalar_lea.vmem %s2773_s0, %s1697_s13  ;;  %s1988_s29 = scalar_lea.vmem %s2775_s2, %s1699_s25  ;;  %v831_v5 = vsub.s32 1, %v2065_v63 }
  0x12   : > { %v1978_v8 = vld [vmem:[%s1969_s16] sm:$0xff]   ;;  %v712_v13 = vld [vmem:[%s1988_s29 + $0x10] sm:$0xff]  ;;  %v711_v14 = vld [vmem:[%s1988_s29 + $0x8] sm:$0xff]  ;;  %s1701_s11 = sshll.u32 %s2815_s27, 3 }
  0x13   : > { %v1981_v9 = vld [vmem:[%s1969_s16 + $0x20] sm:$0xff]   ;;  %1779 = vmatprep.mubr.bf16.mxu0 %v1978_v8  ;;  %vm728_vm1 = vcmp.gt.f32.partialorder %v712_v13, 0.0  ;;  %v713_v15 = vld [vmem:[%s1988_s29 + $0x18] sm:$0xff]  ;;  %vm727_vm2 = vcmp.gt.f32.partialorder %v711_v14, 0.0  ;;  %v715_v19 = vld [vmem:[%s1988_s29 + $0x28] sm:$0xff]  ;;  %s2428_s13 = scalar_lea.vmem %s2777_s4, %s1701_s11  ;;  %s2717_s17 = scalar_lea.vmem %s2778_s5, %s1701_s11 }
  0x14   : > { %1787 = vmatprep.mubr.bf16.mxu1 %v1981_v9  ;;  %v710_v12 = vld [vmem:[%s1988_s29] sm:$0xff]  ;;  %v746_v17 = vsel %vm728_vm1, 1, %v1887_v3  ;;  %vm729_vm3 = vcmp.gt.f32.partialorder %v713_v15, 0.0  ;;  %v745_v20 = vsel %vm727_vm2, 1, %v1887_v3  ;;  %vm731_vm5 = vcmp.gt.f32.partialorder %v715_v19, 0.0  ;;  %v716_v24 = vld [vmem:[%s1988_s29 + $0x30] sm:$0xff] }
  0x15   : > { %vm726_vm0 = vcmp.gt.f32.partialorder %v710_v12, 0.0  ;;  %v714_v18 = vld [vmem:[%s1988_s29 + $0x20] sm:$0xff]  ;;  %767 = vperm.xlu1 %1838, %v746_v17   ;;  %v747_v21 = vsel %vm729_vm3, 1, %v1887_v3  ;;  %v717_v25 = vld [vmem:[%s1988_s29 + $0x38] sm:$0xff]  ;;  %v749_v27 = vsel %vm731_vm5, 1, %v1887_v3  ;;  %vm732_vm6 = vcmp.gt.f32.partialorder %v716_v24, 0.0 }
  0x16   : > { %v744_v16 = vsel %vm726_vm0, 1, %v1887_v3  ;;  %vm730_vm4 = vcmp.gt.f32.partialorder %v714_v18, 0.0  ;;  %vm733_vm7 = vcmp.gt.f32.partialorder %v717_v25, 0.0  ;;  %v718_v28 = vld [vmem:[%s1988_s29 + $0x40] sm:$0xff]  ;;  %v719_v29 = vld [vmem:[%s1988_s29 + $0x48] sm:$0xff]  ;;  %v750_v30 = vsel %vm732_vm6, 1, %v1887_v3 }
  0x17   : > { %761 = vperm.xlu0 %1837, %v744_v16   ;;  %v748_v26 = vsel %vm730_vm4, 1, %v1887_v3  ;;  %v751_v31 = vsel %vm733_vm7, 1, %v1887_v3  ;;  %vm734_vm8 = vcmp.gt.f32.partialorder %v718_v28, 0.0  ;;  %vm735_vm9 = vcmp.gt.f32.partialorder %v719_v29, 0.0  ;;  %v720_v34 = vld [vmem:[%s1988_s29 + $0x50] sm:$0xff]  ;;  %v721_v35 = vld [vmem:[%s1988_s29 + $0x58] sm:$0xff] }
  0x18   : > { %1768 = vmatpush3.bf16.xpose.msra.mxu0 %v1844_v6  ;;  %1805 = vmatpush3.bf16.xpose.msra.mxu1 %v1844_v6  ;;  %v752_v36 = vsel %vm734_vm8, 1, %v1887_v3  ;;  %v753_v37 = vsel %vm735_vm9, 1, %v1887_v3  ;;  %vm736_vm10 = vcmp.gt.f32.partialorder %v720_v34, 0.0  ;;  %vm737_vm11 = vcmp.gt.f32.partialorder %v721_v35, 0.0  ;;  %v722_v38 = vld [vmem:[%s1988_s29 + $0x60] sm:$0xff]  ;;  %v723_v39 = vld [vmem:[%s1988_s29 + $0x68] sm:$0xff] }
  0x19   : > { %1769 = vmatprep.subr.bf16.mxu0 %v1845_v7  ;;  %1798 = vmatprep.subr.bf16.mxu1 %v1845_v7  ;;  %v754_v40 = vsel %vm736_vm10, 1, %v1887_v3  ;;  %v755_v41 = vsel %vm737_vm11, 1, %v1887_v3  ;;  %vm738_vm12 = vcmp.gt.f32.partialorder %v722_v38, 0.0  ;;  %vm739_vm13 = vcmp.gt.f32.partialorder %v723_v39, 0.0  ;;  %v724_v44 = vld [vmem:[%s1988_s29 + $0x70] sm:$0xff]  ;;  %v725_v45 = vld [vmem:[%s1988_s29 + $0x78] sm:$0xff] }
  0x1a   : > { %770 = vperm.xlu1 %1838, %v747_v21   ;;  %v756_v46 = vsel %vm738_vm12, 1, %v1887_v3  ;;  %v757_v47 = vsel %vm739_vm13, 1, %v1887_v3  ;;  %vm740_vm14 = vcmp.gt.f32.partialorder %v724_v44, 0.0  ;;  %vm741_vm15 = vcmp.gt.f32.partialorder %v725_v45, 0.0  ;;  %v1857_v51 = vld [vmem:[%s1969_s16 + $0x8] sm:$0xff]   ;;  %v1859_v53 = vld [vmem:[%s1969_s16 + $0x10] sm:$0xff]  }
  0x1b   : > { %764 = vperm.xlu0 %1837, %v745_v20   ;;  %v758_v48 = vsel %vm740_vm14, 1, %v1887_v3  ;;  %v759_v49 = vsel %vm741_vm15, 1, %v1887_v3  ;;  %v1858_v52 = vld [vmem:[%s1969_s16 + $0x28] sm:$0xff]   ;;  %v1860_v54 = vld [vmem:[%s1969_s16 + $0x30] sm:$0xff]   ;;  %v1861_v55 = vld [vmem:[%s1969_s16 + $0x18] sm:$0xff]   ;;  %vm743_vm0 = vcmp.gt.f32.partialorder %v742_v62, 0.0 }
  0x1c   : > { %v1862_v56 = vld [vmem:[%s1969_s16 + $0x38] sm:$0xff]   ;;  %v824_v4 = vsel %vm743_vm0, 1, %v1887_v3  ;;  %s1704_s16 = sshll.u32 %s2813_s21, 1 }
  0x1d   : > { %v2074_v6 = vrot.slane %v824_v4, %v827_v2  ;;  %s370_s10 = scalar_lea.vmem %s2779_s6, %s1704_s16 }
  0x1e   : > { %776 = vperm.xlu1 %1838, %v749_v27  }
  0x1f   : > { %773 = vperm.xlu0 %1837, %v748_v26   ;;  %vm833_vm1 = vcmp.eq.s32.totalorder %v2074_v6, 1 }
  0x20   : > { %1770 = vmatpush3.bf16.xpose.msra.mxu0 %v1846_v10  ;;  %1806 = vmatpush3.bf16.xpose.msra.mxu1 %v1846_v10 }
  0x21   : > { %1771 = vmatprep.subr.bf16.mxu0 %v1847_v11  ;;  %1799 = vmatprep.subr.bf16.mxu1 %v1847_v11 }
  0x22   : > { %782 = vperm.xlu1 %1838, %v751_v31  }
  0x23   : > { %779 = vperm.xlu0 %1837, %v750_v30  }
  0x26   : > { %788 = vperm.xlu1 %1838, %v753_v37  }
  0x27   : > { %785 = vperm.xlu0 %1837, %v752_v36  }
  0x28   : > { %1772 = vmatpush3.bf16.xpose.msra.mxu0 %v1848_v22  ;;  %1807 = vmatpush3.bf16.xpose.msra.mxu1 %v1848_v22 }
  0x29   : > { %1773 = vmatprep.subr.bf16.mxu0 %v1849_v23  ;;  %1800 = vmatprep.subr.bf16.mxu1 %v1849_v23 }
  0x2a   : > { %794 = vperm.xlu1 %1838, %v755_v41  }
  0x2b   : > { %791 = vperm.xlu0 %1837, %v754_v40  }
  0x2e   : > { %800 = vperm.xlu1 %1838, %v757_v47  }
  0x2f   : > { %797 = vperm.xlu0 %1837, %v756_v46  }
  0x30   : > { %1774 = vmatpush3.bf16.xpose.msra.mxu0 %v1850_v32  ;;  %1808 = vmatpush3.bf16.xpose.msra.mxu1 %v1850_v32 }
  0x31   : > { %1775 = vmatprep.subr.bf16.mxu0 %v1851_v33  ;;  %1801 = vmatprep.subr.bf16.mxu1 %v1851_v33 }
  0x32   : > { %806 = vperm.xlu1 %1838, %v759_v49  }
  0x33   : > { %803 = vperm.xlu0 %1837, %v758_v48  }
  0x38   : > { %1776 = vmatpush3.bf16.xpose.msra.mxu0 %v1852_v42  ;;  %1809 = vmatpush3.bf16.xpose.msra.mxu1 %v1852_v42 }
  0x39   : > { %1777 = vmatprep.subr.bf16.mxu0 %v1853_v43  ;;  %1802 = vmatprep.subr.bf16.mxu1 %v1853_v43 }
  0x40   : > { %1778 = vmatpush3.bf16.xpose.msra.mxu0 %v1854_v50  ;;  %1810 = vmatpush3.bf16.xpose.msra.mxu1 %v1854_v50 }
  0x47   : > { %1780 = vmatmul.mubr.bf16.vlgmr.msra.gmra.mrb[0].mxu0 %v1978_v8  ;;  %1788 = vmatmul.mubr.bf16.vlgmr.msra.gmra.mrb[0].mxu1 %v1981_v9  ;;  %v2078_v8 = vrot.slane %v824_v4, %v831_v5 }
  0x48   : > { %1781 = vmatprep.mubr.bf16.mxu0 %v1857_v51  ;;  %1789 = vmatprep.mubr.bf16.mxu1 %v1858_v52 }
  0x49   : > { %vm834_vm3 = vcmp.eq.s32.totalorder %v2078_v8, 1 }
  0x4f   : > { %1782 = vmatmul.mubr.bf16.gmra.mrb[4].mxu0 %v1857_v51  ;;  %1790 = vmatmul.mubr.bf16.gmra.mrb[4].mxu1 %v1858_v52 }
  0x50   : > { %1783 = vmatprep.mubr.bf16.mxu0 %v1859_v53  ;;  %1791 = vmatprep.mubr.bf16.mxu1 %v1860_v54 }
  0x57   : > { %1784 = vmatmul.mubr.bf16.gmra.mrb[8].mxu0 %v1859_v53  ;;  %1792 = vmatmul.mubr.bf16.gmra.mrb[8].mxu1 %v1860_v54 }
  0x58   : > { %1785 = vmatprep.mubr.bf16.mxu0 %v1861_v55  ;;  %1793 = vmatprep.mubr.bf16.mxu1 %v1862_v56 }
  0x5f   : > { %1786 = vmatmul.mubr.bf16.gmra.mrb[12].mxu0 %v1861_v55  ;;  %1794 = vmatmul.mubr.bf16.gmra.mrb[12].mxu1 %v1862_v56 }
  0x94   : > { %v2057_v58 = vpop.permute.xlu1 %767 }
  0x95   : > { %vm810_vm10 = vcmp.eq.s32.totalorder %v2057_v58, 1 }
  0x96   : > { %v762_v57 = vpop.permute.xlu0 %761 }
  0x97   : > { %vm808_vm2 = vcmp.eq.s32.totalorder %v762_v57, 1 }
  0x98   : > { %vm2086_vm5 = vmand %vm808_vm2, %vm833_vm1 }
  0x99   : > { %v2059_v61 = vpop.permute.xlu1 %770  ;;  %vm2092_vm7 = vmand %vm808_vm2, %vm834_vm3 }
  0x9a   : > { %v765_v60 = vpop.permute.xlu0 %764  ;;  %vm811_vm15 = vcmp.eq.s32.totalorder %v2059_v61, 1  ;;  %vm2146_vm2 = vmand %vm810_vm10, %vm833_vm1 }
  0x9b   : > { %vm809_vm4 = vcmp.eq.s32.totalorder %v765_v60, 1 }
  0x9c   : > { %vm2099_vm8 = vmand %vm809_vm4, %vm833_vm1 }
  0x9d   : > { %v2069_v1 = vpop.permute.xlu1 %776  ;;  %vm838_vm14 = vmand %vm809_vm4, %vm834_vm3 }
  0x9e   : > { %v2067_v0 = vpop.permute.xlu0 %773 }
  0xa1   : > { %v2080_v9 = vpop.permute.xlu1 %782 }
  0xa2   : > { %v2076_v7 = vpop.permute.xlu0 %779 }
  0xa5   : > { %v789_v11 = vpop.permute.xlu1 %788 }
  0xa6   : > { %v786_v10 = vpop.permute.xlu0 %785  ;;  %vm817_vm9 = vcmp.eq.s32.totalorder %v789_v11, 1 }
  0xa7   : > { %vm816_vm6 = vcmp.eq.s32.totalorder %v786_v10, 1  ;;  %vm853_vm13 = vmand %vm817_vm9, %vm833_vm1 }
  0xa8   : > { %vm851_vm11 = vmand %vm816_vm6, %vm833_vm1 }
  0xa9   : > { %vm852_vm12 = vmand %vm816_vm6, %vm834_vm3  ;;  %v795_v40 = vpop.permute.xlu1 %794 }
  0xaa   : > { %vm854_vm0 = vmand %vm817_vm9, %vm834_vm3  ;;  %v792_v36 = vpop.permute.xlu0 %791 }
  0xab   : > { %vm818_vm4 = vcmp.eq.s32.totalorder %v792_v36, 1  ;;  %vm2166_vm6 = vmand %vm811_vm15, %vm833_vm1 }
  0xac   : > { %vm855_vm9 = vmand %vm818_vm4, %vm833_vm1 }
  0xae   : > { %v798_v11 = vpop.permute.xlu0 %797 }
  0xb2   : > { %v804_v39 = vpop.permute.xlu0 %803 }
 0x11a   : > { %v599_v13 = vpop.f32.mrb[0].mxu0  ;;  %v639_v14 = vpop.f32.mrb[0].mxu1 }
 0x11b   : > { %v678_v16 = vmul.f32 0.3125, %v599_v13  ;;  %v694_v17 = vmul.f32 0.3125, %v639_v14  ;;  %v601_v18 = vpop.f32.mrb[1].mxu0  ;;  %v641_v19 = vpop.f32.mrb[1].mxu1 }
 0x11c   : > { %v679_v20 = vmul.f32 0.3125, %v601_v18  ;;  %v695_v21 = vmul.f32 0.3125, %v641_v19  ;;  %v603_v22 = vpop.f32.mrb[2].mxu0  ;;  %v643_v23 = vpop.f32.mrb[2].mxu1 }
 0x11d   : > { %v2112_v24 = vsel %vm2086_vm5, %v678_v16, -1e+30  ;;  %v2114_v25 = vsel %vm851_vm11, %v694_v17, -1e+30  ;;  %v680_v26 = vmul.f32 0.3125, %v603_v22  ;;  %v696_v27 = vmul.f32 0.3125, %v643_v23  ;;  %vm2158_vm5 = vmand %vm810_vm10, %vm834_vm3  ;;  %v801_v18 = vpop.permute.xlu1 %800 }
 0x11e   : > { %v2121_v28 = vsel %vm2092_vm7, %v679_v20, -1e+30  ;;  %v2123_v29 = vsel %vm852_vm12, %v695_v21, -1e+30  ;;  %v605_v30 = vpop.f32.mrb[3].mxu0  ;;  %v645_v31 = vpop.f32.mrb[3].mxu1  ;;  %vm856_vm10 = vmand %vm818_vm4, %vm834_vm3 }
 0x11f   : > { %v2130_v32 = vsel %vm2099_vm8, %v680_v26, -1e+30  ;;  %v2132_v33 = vsel %vm853_vm13, %v696_v27, -1e+30  ;;  %v681_v34 = vmul.f32 0.3125, %v605_v30  ;;  %v697_v35 = vmul.f32 0.3125, %v645_v31  ;;  %vm2200_vm12 = vmand %vm811_vm15, %vm834_vm3 }
 0x120   : > { %v923_v37 = vmax.f32 %v2114_v25, %v2123_v29  ;;  %v899_v38 = vmax.f32 %v2112_v24, %v2121_v28  ;;  %vm812_vm7 = vcmp.eq.s32.totalorder %v2067_v0, 1  ;;  %vm819_vm8 = vcmp.eq.s32.totalorder %v795_v40, 1 }
 0x121   : > { %v2150_v41 = vsel %vm838_vm14, %v681_v34, -1e+30  ;;  %v2152_v42 = vsel %vm854_vm0, %v697_v35, -1e+30  ;;  %vm857_vm11 = vmand %vm819_vm8, %vm833_vm1  ;;  %vm813_vm13 = vcmp.eq.s32.totalorder %v2069_v1, 1  ;;  %vm820_vm0 = vcmp.eq.s32.totalorder %v798_v11, 1 }
 0x122   : > { %924 = vmax.xlane.f32.xlu1 %v923_v37  ;;  %900 = vmax.xlane.f32.xlu0 %v899_v38  ;;  %v609_v44 = vpop.f32.mrb[4].mxu0  ;;  %v649_v45 = vpop.f32.mrb[4].mxu1  ;;  %v926_v55 = vmax.f32 %v2132_v33, %v2152_v42  ;;  %v902_v56 = vmax.f32 %v2130_v32, %v2150_v41  ;;  %vm858_vm14 = vmand %vm819_vm8, %vm834_vm3 }
 0x123   : > { %v682_v47 = vmul.f32 0.3125, %v609_v44  ;;  %v698_v48 = vmul.f32 0.3125, %v649_v45  ;;  %v611_v49 = vpop.f32.mrb[5].mxu0  ;;  %v651_v50 = vpop.f32.mrb[5].mxu1  ;;  %vm2222_vm15 = vmand %vm812_vm7, %vm833_vm1 }
 0x124   : > { %v683_v51 = vmul.f32 0.3125, %v611_v49  ;;  %v699_v52 = vmul.f32 0.3125, %v651_v50  ;;  %v613_v53 = vpop.f32.mrb[6].mxu0  ;;  %v653_v54 = vpop.f32.mrb[6].mxu1  ;;  %vm2244_vm4 = vmand %vm813_vm13, %vm833_vm1 }
 0x125   : > { %v2183_v57 = vsel %vm2146_vm2, %v682_v47, -1e+30  ;;  %v2185_v58 = vsel %vm855_vm9, %v698_v48, -1e+30  ;;  %v684_v60 = vmul.f32 0.3125, %v613_v53  ;;  %v700_v62 = vmul.f32 0.3125, %v653_v54  ;;  %vm2232_vm2 = vmand %vm812_vm7, %vm834_vm3 }
 0x126   : > { %v2192_v2 = vsel %vm2158_vm5, %v683_v51, -1e+30  ;;  %v2194_v4 = vsel %vm856_vm10, %v699_v52, -1e+30  ;;  %v655_v5 = vpop.f32.mrb[7].mxu1  ;;  %927 = vmax.xlane.f32.xlu0 %v926_v55  ;;  %903 = vmax.xlane.f32.xlu1 %v902_v56  ;;  %v615_v10 = vpop.f32.mrb[7].mxu0  ;;  %vm859_vm7 = vmand %vm820_vm0, %vm833_vm1  ;;  %v1442_v1 = vmax.f32 %v2112_v24, %v2183_v57 }
 0x127   : > { %v2206_v12 = vsel %vm2166_vm6, %v684_v60, -1e+30  ;;  %v2208_v13 = vsel %vm857_vm11, %v700_v62, -1e+30  ;;  %v701_v14 = vmul.f32 0.3125, %v655_v5  ;;  %v685_v15 = vmul.f32 0.3125, %v615_v10  ;;  %vm860_vm8 = vmand %vm820_vm0, %vm834_vm3  ;;  %v807_v51 = vpop.permute.xlu1 %806 }
 0x128   : > { %v929_v61 = vmax.f32 %v2185_v58, %v2194_v4  ;;  %v905_v16 = vmax.f32 %v2183_v57, %v2192_v2  ;;  %vm821_vm5 = vcmp.eq.s32.totalorder %v801_v18, 1  ;;  %vm814_vm6 = vcmp.eq.s32.totalorder %v2076_v7, 1  ;;  %vm2276_vm10 = vmand %vm813_vm13, %vm834_vm3 }
 0x129   : > { %v2226_v19 = vsel %vm858_vm14, %v701_v14, -1e+30  ;;  %v2238_v21 = vsel %vm2200_vm12, %v685_v15, -1e+30  ;;  %vm861_vm9 = vmand %vm821_vm5, %vm833_vm1  ;;  %vm815_vm11 = vcmp.eq.s32.totalorder %v2080_v9, 1  ;;  %vm822_vm14 = vcmp.eq.s32.totalorder %v804_v39, 1 }
 0x12a   : > { %930 = vmax.xlane.f32.xlu1 %v929_v61  ;;  %906 = vmax.xlane.f32.xlu0 %v905_v16  ;;  %v619_v22 = vpop.f32.mrb[8].mxu0  ;;  %v659_v23 = vpop.f32.mrb[8].mxu1  ;;  %v908_v38 = vmax.f32 %v2206_v12, %v2238_v21  ;;  %vm862_vm12 = vmand %vm821_vm5, %vm834_vm3  ;;  %v932_v56 = vmax.f32 %v2208_v13, %v2226_v19  ;;  %v1463_v5 = vmax.f32 %v2121_v28, %v2192_v2  ;;  %vm823_vm0 = vcmp.eq.s32.totalorder %v807_v51, 1 }
 0x12b   : > { %v686_v0 = vmul.f32 0.3125, %v619_v22  ;;  %v702_v27 = vmul.f32 0.3125, %v659_v23  ;;  %v621_v30 = vpop.f32.mrb[9].mxu0  ;;  %v661_v31 = vpop.f32.mrb[9].mxu1  ;;  %vm2300_vm13 = vmand %vm814_vm6, %vm833_vm1  ;;  %v1443_v10 = vmax.f32 %v2130_v32, %v2206_v12  ;;  %v1464_v14 = vmax.f32 %v2150_v41, %v2238_v21 }
 0x12c   : > { %v687_v34 = vmul.f32 0.3125, %v621_v30  ;;  %v703_v35 = vmul.f32 0.3125, %v661_v31  ;;  %v623_v36 = vpop.f32.mrb[10].mxu0  ;;  %v663_v37 = vpop.f32.mrb[10].mxu1  ;;  %vm864_vm5 = vmand %vm822_vm14, %vm834_vm3 }
 0x12d   : > { %v2259_v40 = vsel %vm2222_vm15, %v686_v0, -1e+30  ;;  %v2261_v43 = vsel %vm859_vm7, %v702_v27, -1e+30  ;;  %v688_v44 = vmul.f32 0.3125, %v623_v36  ;;  %v704_v45 = vmul.f32 0.3125, %v663_v37  ;;  %vm2314_vm15 = vmand %vm814_vm6, %vm834_vm3 }
 0x12e   : > { %v2268_v46 = vsel %vm2232_vm2, %v687_v34, -1e+30  ;;  %v2270_v47 = vsel %vm860_vm8, %v703_v35, -1e+30  ;;  %v665_v48 = vpop.f32.mrb[11].mxu1  ;;  %909 = vmax.xlane.f32.xlu0 %v908_v38  ;;  %v625_v49 = vpop.f32.mrb[11].mxu0  ;;  %v1444_v15 = vmax.f32 %v1442_v1, %v2259_v40  ;;  %vm2329_vm2 = vmand %vm815_vm11, %vm833_vm1 }
 0x12f   : > { %v2283_v52 = vsel %vm2244_vm4, %v688_v44, -1e+30  ;;  %v2285_v53 = vsel %vm861_vm9, %v704_v45, -1e+30  ;;  %v705_v54 = vmul.f32 0.3125, %v665_v48  ;;  %v689_v55 = vmul.f32 0.3125, %v625_v49  ;;  %vm863_vm4 = vmand %vm822_vm14, %vm833_vm1 }
 0x130   : > { %v911_v60 = vmax.f32 %v2259_v40, %v2268_v46  ;;  %v1465_v18 = vmax.f32 %v1463_v5, %v2268_v46  ;;  %v1445_v20 = vmax.f32 %v1443_v10, %v2283_v52  ;;  %v935_v35 = vmax.f32 %v2261_v43, %v2270_v47  ;;  %vm865_vm6 = vmand %vm823_vm0, %vm833_vm1 }
 0x131   : > { %v2308_v3 = vsel %vm862_vm12, %v705_v54, -1e+30  ;;  %v2323_v61 = vsel %vm2276_vm10, %v689_v55, -1e+30  ;;  %vm866_vm1 = vmand %vm823_vm0, %vm834_vm3  ;;  %vm1292_vm8 = vcmask 7168  }
 0x132   : > { %933 = vmax.xlane.f32.xlu0 %v932_v56  ;;  %912 = vmax.xlane.f32.xlu1 %v911_v60  ;;  %v629_v16 = vpop.f32.mrb[12].mxu0  ;;  %v669_v17 = vpop.f32.mrb[12].mxu1  ;;  %v914_v36 = vmax.f32 %v2283_v52, %v2323_v61  ;;  %v938_v1 = vmax.f32 %v2285_v53, %v2308_v3  ;;  %vm850_vm7 = vmand %vm815_vm11, %vm834_vm3  ;;  %vm1504_vm3 = vcmp.lt.s32.totalorder %v825_v59, 256 }
 0x133   : > { %v690_v22 = vmul.f32 0.3125, %v629_v16  ;;  %v706_v23 = vmul.f32 0.3125, %v669_v17  ;;  %v631_v26 = vpop.f32.mrb[13].mxu0  ;;  %v671_v0 = vpop.f32.mrb[13].mxu1 }
 0x134   : > { %v691_v27 = vmul.f32 0.3125, %v631_v26  ;;  %v707_v30 = vmul.f32 0.3125, %v671_v0  ;;  %v633_v31 = vpop.f32.mrb[14].mxu0  ;;  %v673_v34 = vpop.f32.mrb[14].mxu1 }
 0x135   : > { %v2347_v37 = vsel %vm2300_vm13, %v690_v22, -1e+30  ;;  %v2349_v38 = vsel %vm863_vm4, %v706_v23, -1e+30  ;;  %v692_v44 = vmul.f32 0.3125, %v633_v31  ;;  %v708_v45 = vmul.f32 0.3125, %v673_v34 }
 0x136   : > { %v1446_v48 = vmax.f32 %v1444_v15, %v2347_v37  ;;  %v2357_v49 = vsel %vm2314_vm15, %v691_v27, -1e+30  ;;  %v2359_v39 = vsel %vm864_vm5, %v707_v30, -1e+30  ;;  %v675_v50 = vpop.f32.mrb[15].mxu1  ;;  %936 = vmax.xlane.f32.xlu1 %v935_v35  ;;  %915 = vmax.xlane.f32.xlu0 %v914_v36  ;;  %v635_v54 = vpop.f32.mrb[15].mxu0  ;;  %v1466_v15 = vmax.f32 %v1464_v14, %v2323_v61 }
 0x137   : > { %v1467_v55 = vmax.f32 %v1465_v18, %v2357_v49  ;;  %v2366_v6 = vsel %vm2329_vm2, %v692_v44, -1e+30  ;;  %v2368_v56 = vsel %vm865_vm6, %v708_v45, -1e+30  ;;  %v709_v60 = vmul.f32 0.3125, %v675_v50 }
 0x138   : > { %v1448_v62 = vmax.f32 %v1446_v48, %v2114_v25  ;;  %v1447_v5 = vmax.f32 %v1445_v20, %v2366_v6  ;;  %v693_v10 = vmul.f32 0.3125, %v635_v54  ;;  %v917_v11 = vmax.f32 %v2347_v37, %v2357_v49 }
 0x139   : > { %v1469_v16 = vmax.f32 %v1467_v55, %v2123_v29  ;;  %v2383_v17 = vsel %vm866_vm1, %v709_v60, -1e+30  ;;  %v941_v22 = vmax.f32 %v2349_v38, %v2359_v39 }
 0x13a   : > { %v1450_v51 = vmax.f32 %v1448_v62, %v2185_v58  ;;  %v1449_v7 = vmax.f32 %v1447_v5, %v2132_v33  ;;  %v2387_v18 = vsel %vm850_vm7, %v693_v10, -1e+30  ;;  %939 = vmax.xlane.f32.xlu0 %v938_v1  ;;  %918 = vmax.xlane.f32.xlu1 %v917_v11  ;;  %v944_v35 = vmax.f32 %v2368_v56, %v2383_v17 }
 0x13b   : > { %v1471_v20 = vmax.f32 %v1469_v16, %v2194_v4  ;;  %v1468_v8 = vmax.f32 %v1466_v15, %v2387_v18  ;;  %v920_v23 = vmax.f32 %v2366_v6, %v2387_v18  ;;  %v1888_v5 = vmov 1966171168  }
 0x13c   : > { %v1452_v9 = vmax.f32 %v1450_v51, %v2261_v43  ;;  %v1451_v14 = vmax.f32 %v1449_v7, %v2208_v13  ;;  %v1488_v10 = vunpack.c.l.s4 %v1888_v5 }
 0x13d   : > { %v1470_v26 = vmax.f32 %v1468_v8, %v2152_v42  ;;  %v1473_v27 = vmax.f32 %v1471_v20, %v2270_v47 }
 0x13e   : > { %v1453_v0 = vmax.f32 %v1451_v14, %v2285_v53  ;;  %942 = vmax.xlane.f32.xlu1 %v941_v22  ;;  %921 = vmax.xlane.f32.xlu0 %v920_v23  ;;  %v1454_v31 = vmax.f32 %v1452_v9, %v2349_v38  ;;  %v1489_v7 = vunpack.c.0.s8 %v1488_v10 }
 0x13f   : > { %v1472_v30 = vmax.f32 %v1470_v26, %v2226_v19  ;;  %v1475_v45 = vmax.f32 %v1473_v27, %v2359_v39 }
 0x140   : > { %v1455_v34 = vmax.f32 %v1453_v0, %v2368_v56  ;;  %v1492_v14 = vsub.s32 %v1489_v7, %v2065_v63  ;;  %v2420_v0 = vand.u32 127, %v825_v59 }
 0x141   : > { %v1474_v36 = vmax.f32 %v1472_v30, %v2308_v3 }
 0x142   : > { %v1456_v44 = vmax.f32 %v1454_v31, %v1455_v34  ;;  %945 = vmax.xlane.f32.xlu0 %v944_v35  ;;  %v2431_v63 = vadd.s32 128, %v2420_v0 }
 0x143   : > { %v1476_v48 = vmax.f32 %v1474_v36, %v2383_v17 }
 0x144   : > { %v1457_v50 = vrot.slane %v1456_v44, 4 }
 0x145   : > { %v1477_v54 = vmax.f32 %v1475_v45, %v1476_v48 }
 0x146   : > { %v1458_v1 = vmax.f32 %v1456_v44, %v1457_v50 }
 0x147   : > { %v1478_v55 = vrot.slane %v1477_v54, 4 }
 0x148   : > { %v1459_v60 = vrot.slane %v1458_v1, 2 }
 0x149   : > { %v1479_v62 = vmax.f32 %v1477_v54, %v1478_v55 }
 0x14a   : > { %v1460_v11 = vmax.f32 %v1458_v1, %v1459_v60 }
 0x14b   : > { %v1480_v15 = vrot.slane %v1479_v62, 2 }
 0x14c   : > { %v1461_v16 = vrot.slane %v1460_v11, 1 }
 0x14d   : > { %v1481_v51 = vmax.f32 %v1479_v62, %v1480_v15 }
 0x14e   : > { %v1462_v20 = vmax.f32 %v1460_v11, %v1461_v16 }
 0x14f   : > { %v1482_v8 = vrot.slane %v1481_v51, 1 }
 0x151   : > { %v1483_v9 = vmax.f32 %v1481_v51, %v1482_v8 }
 0x153   : > { %v1486_v22 = vcombine.low %v1462_v20, %v1483_v9 }
 0x155   : > { %v1493_v23 = vrot.slane %v1486_v22, %v1492_v14 }
 0x157   : > { %v1500_v26 = vrot.slane %v1493_v23, %v1492_v14 }
 0x159   : > { %1506 = vst.msk [vmem:[%s370_s10] sm:$0x3] %vm1504_vm3, %v1500_v26 }
 0x1af   : > { %v925_v27 = vpop.xlane.xlu1 %924  ;;  %v901_v30 = vpop.xlane.xlu0 %900 }
 0x1b0   : > { %vm966_vm9 = vcmp.eq.f32.partialorder %v2114_v25, %v925_v27  ;;  %vm967_vm10 = vcmp.eq.f32.partialorder %v2123_v29, %v925_v27  ;;  %1301 = vst.msk [vmem:[%s2428_s13 + $0x40] sm:$0xff] %vm1292_vm8, %v925_v27  ;;  %vm950_vm11 = vcmp.eq.f32.partialorder %v2112_v24, %v901_v30  ;;  %vm951_vm12 = vcmp.eq.f32.partialorder %v2121_v28, %v901_v30 }
 0x1b1   : > { %1293 = vst.msk [vmem:[%s2428_s13] sm:$0xff] %vm1292_vm8, %v901_v30  ;;  %v998_v59 = vsel %vm966_vm9, %v2420_v0, 1073741824  ;;  %v999_v31 = vsel %vm967_vm10, %v2431_v63, 1073741824  ;;  %v982_v34 = vsel %vm950_vm11, %v2420_v0, 1073741824  ;;  %v983_v25 = vsel %vm951_vm12, %v2431_v63, 1073741824 }
 0x1b2   : > { %vm1014_vm13 = vcmp.lt.s32.totalorder %v982_v34, %v983_v25  ;;  %vm1142_vm14 = vcmp.lt.s32.totalorder %v998_v59, %v999_v31 }
 0x1b3   : > { %v928_v29 = vpop.xlane.xlu0 %927  ;;  %v904_v35 = vpop.xlane.xlu1 %903  ;;  %v2445_v36 = vsel %vm1014_vm13, %v982_v34, %v983_v25 }
 0x1b4   : > { %vm968_vm15 = vcmp.eq.f32.partialorder %v2132_v33, %v928_v29  ;;  %vm969_vm0 = vcmp.eq.f32.partialorder %v2152_v42, %v928_v29  ;;  %1302 = vst.msk [vmem:[%s2428_s13 + $0x48] sm:$0xff] %vm1292_vm8, %v928_v29  ;;  %vm952_vm2 = vcmp.eq.f32.partialorder %v2130_v32, %v904_v35  ;;  %vm953_vm4 = vcmp.eq.f32.partialorder %v2150_v41, %v904_v35 }
 0x1b5   : > { %1294 = vst.msk [vmem:[%s2428_s13 + $0x8] sm:$0xff] %vm1292_vm8, %v904_v35  ;;  %v1000_v24 = vsel %vm968_vm15, %v2420_v0, 1073741824  ;;  %v1001_v28 = vsel %vm969_vm0, %v2431_v63, 1073741824  ;;  %v984_v44 = vsel %vm952_vm2, %v2420_v0, 1073741824  ;;  %v985_v33 = vsel %vm953_vm4, %v2431_v63, 1073741824 }
 0x1b6   : > { %v1017_v42 = vshra.s32 %v2445_v36, 16  ;;  %vm1030_vm5 = vcmp.lt.s32.totalorder %v984_v44, %v985_v33  ;;  %vm1158_vm6 = vcmp.lt.s32.totalorder %v1000_v24, %v1001_v28  ;;  %v2461_v41 = vsel %vm1142_vm14, %v998_v59, %v999_v31 }
 0x1b7   : > { %v931_v45 = vpop.xlane.xlu1 %930  ;;  %v907_v32 = vpop.xlane.xlu0 %906  ;;  %v2463_v48 = vsel %vm1030_vm5, %v984_v44, %v985_v33  ;;  %v2465_v50 = vsel %vm1158_vm6, %v1000_v24, %v1001_v28 }
 0x1b8   : > { %vm970_vm1 = vcmp.eq.f32.partialorder %v2185_v58, %v931_v45  ;;  %vm971_vm7 = vcmp.eq.f32.partialorder %v2194_v4, %v931_v45  ;;  %1303 = vst.msk [vmem:[%s2428_s13 + $0x50] sm:$0xff] %vm1292_vm8, %v931_v45  ;;  %vm954_vm3 = vcmp.eq.f32.partialorder %v2183_v57, %v907_v32  ;;  %vm955_vm9 = vcmp.eq.f32.partialorder %v2192_v2, %v907_v32 }
 0x1b9   : > { %1295 = vst.msk [vmem:[%s2428_s13 + $0x10] sm:$0xff] %vm1292_vm8, %v907_v32  ;;  %v1002_v54 = vsel %vm970_vm1, %v2420_v0, 1073741824  ;;  %v1003_v1 = vsel %vm971_vm7, %v2431_v63, 1073741824  ;;  %v986_v55 = vsel %vm954_vm3, %v2420_v0, 1073741824  ;;  %v987_v60 = vsel %vm955_vm9, %v2431_v63, 1073741824 }
 0x1ba   : > { %v2479_v58 = vcvt.s32.f32 %v1017_v42  ;;  %v1145_v4 = vshra.s32 %v2461_v41, 16  ;;  %v1033_v62 = vshra.s32 %v2463_v48, 16  ;;  %vm1046_vm10 = vcmp.lt.s32.totalorder %v986_v55, %v987_v60 }
 0x1bb   : > { %v910_v57 = vpop.xlane.xlu0 %909  ;;  %v2483_v2 = vsel %vm1046_vm10, %v986_v55, %v987_v60  ;;  %v1161_v5 = vshra.s32 %v2465_v50, 16  ;;  %vm1174_vm11 = vcmp.lt.s32.totalorder %v1002_v54, %v1003_v1 }
 0x1bc   : > { %1020 = vmin.xlane.f32.xlu1 %v2479_v58  ;;  %vm956_vm12 = vcmp.eq.f32.partialorder %v2206_v12, %v910_v57  ;;  %vm957_vm13 = vcmp.eq.f32.partialorder %v2238_v21, %v910_v57  ;;  %1296 = vst.msk [vmem:[%s2428_s13 + $0x18] sm:$0xff] %vm1292_vm8, %v910_v57  ;;  %v2491_v10 = vcvt.s32.f32 %v1033_v62  ;;  %v1049_v11 = vshra.s32 %v2483_v2, 16 }
 0x1bd   : > { %v988_v15 = vsel %vm956_vm12, %v2420_v0, 1073741824  ;;  %v989_v16 = vsel %vm957_vm13, %v2431_v63, 1073741824  ;;  %v2496_v51 = vsel %vm1174_vm11, %v1002_v54, %v1003_v1  ;;  %v2498_v7 = vcvt.s32.f32 %v1145_v4 }
 0x1be   : > { %1036 = vmin.xlane.f32.xlu0 %v2491_v10  ;;  %vm1062_vm14 = vcmp.lt.s32.totalorder %v988_v15, %v989_v16  ;;  %v2501_v20 = vcvt.s32.f32 %v1049_v11  ;;  %v2503_v8 = vcvt.s32.f32 %v1161_v5  ;;  %v1177_v9 = vshra.s32 %v2496_v51, 16 }
 0x1bf   : > { %v934_v12 = vpop.xlane.xlu0 %933  ;;  %v913_v21 = vpop.xlane.xlu1 %912  ;;  %v2506_v14 = vsel %vm1062_vm14, %v988_v15, %v989_v16 }
 0x1c0   : > { %1148 = vmin.xlane.f32.xlu1 %v2498_v7  ;;  %vm972_vm15 = vcmp.eq.f32.partialorder %v2208_v13, %v934_v12  ;;  %vm973_vm0 = vcmp.eq.f32.partialorder %v2226_v19, %v934_v12  ;;  %1304 = vst.msk [vmem:[%s2428_s13 + $0x58] sm:$0xff] %vm1292_vm8, %v934_v12  ;;  %vm958_vm2 = vcmp.eq.f32.partialorder %v2259_v40, %v913_v21  ;;  %1297 = vst.msk [vmem:[%s2428_s13 + $0x20] sm:$0xff] %vm1292_vm8, %v913_v21 }
 0x1c1   : > { %vm959_vm4 = vcmp.eq.f32.partialorder %v2268_v46, %v913_v21  ;;  %v1004_v22 = vsel %vm972_vm15, %v2420_v0, 1073741824  ;;  %v1005_v23 = vsel %vm973_vm0, %v2431_v63, 1073741824  ;;  %v990_v26 = vsel %vm958_vm2, %v2420_v0, 1073741824 }
 0x1c2   : > { %v991_v27 = vsel %vm959_vm4, %v2431_v63, 1073741824  ;;  %1164 = vmin.xlane.f32.xlu0 %v2503_v8  ;;  %v1065_v13 = vshra.s32 %v2506_v14, 16  ;;  %vm1190_vm6 = vcmp.lt.s32.totalorder %v1004_v22, %v1005_v23  ;;  %v2523_v46 = vcvt.s32.f32 %v1177_v9 }
 0x1c3   : > { %vm1078_vm5 = vcmp.lt.s32.totalorder %v990_v26, %v991_v27  ;;  %v937_v19 = vpop.xlane.xlu1 %936  ;;  %v916_v40 = vpop.xlane.xlu0 %915  ;;  %v2527_v59 = vsel %vm1190_vm6, %v1004_v22, %v1005_v23 }
 0x1c4   : > { %v2525_v30 = vsel %vm1078_vm5, %v990_v26, %v991_v27  ;;  %1052 = vmin.xlane.f32.xlu1 %v2501_v20  ;;  %vm974_vm1 = vcmp.eq.f32.partialorder %v2261_v43, %v937_v19  ;;  %vm975_vm7 = vcmp.eq.f32.partialorder %v2270_v47, %v937_v19  ;;  %1305 = vst.msk [vmem:[%s2428_s13 + $0x60] sm:$0xff] %vm1292_vm8, %v937_v19  ;;  %1298 = vst.msk [vmem:[%s2428_s13 + $0x28] sm:$0xff] %vm1292_vm8, %v916_v40 }
 0x1c5   : > { %vm960_vm3 = vcmp.eq.f32.partialorder %v2283_v52, %v916_v40  ;;  %vm961_vm9 = vcmp.eq.f32.partialorder %v2323_v61, %v916_v40  ;;  %v1006_v31 = vsel %vm974_vm1, %v2420_v0, 1073741824  ;;  %v1007_v34 = vsel %vm975_vm7, %v2431_v63, 1073741824 }
 0x1c6   : > { %v992_v25 = vsel %vm960_vm3, %v2420_v0, 1073741824  ;;  %v993_v43 = vsel %vm961_vm9, %v2431_v63, 1073741824  ;;  %v2542_v29 = vcvt.s32.f32 %v1065_v13  ;;  %v1081_v47 = vshra.s32 %v2525_v30, 16 }
 0x1c7   : > { %v1193_v52 = vshra.s32 %v2527_v59, 16  ;;  %vm1206_vm10 = vcmp.lt.s32.totalorder %v1006_v31, %v1007_v34  ;;  %v940_v61 = vpop.xlane.xlu0 %939  ;;  %v919_v35 = vpop.xlane.xlu1 %918  ;;  %vm1094_vm11 = vcmp.lt.s32.totalorder %v992_v25, %v993_v43  ;;  %v1016_v27 = vand.u32 65535, %v2445_v36 }
 0x1c8   : > { %v2546_v24 = vsel %vm1206_vm10, %v1006_v31, %v1007_v34  ;;  %1180 = vmin.xlane.f32.xlu1 %v2523_v46  ;;  %1068 = vmin.xlane.f32.xlu0 %v2542_v29  ;;  %vm976_vm12 = vcmp.eq.f32.partialorder %v2285_v53, %v940_v61  ;;  %vm977_vm13 = vcmp.eq.f32.partialorder %v2308_v3, %v940_v61  ;;  %v2557_v28 = vcvt.s32.f32 %v1081_v47 }
 0x1c9   : > { %1306 = vst.msk [vmem:[%s2428_s13 + $0x68] sm:$0xff] %vm1292_vm8, %v940_v61  ;;  %vm962_vm14 = vcmp.eq.f32.partialorder %v2347_v37, %v919_v35  ;;  %1299 = vst.msk [vmem:[%s2428_s13 + $0x30] sm:$0xff] %vm1292_vm8, %v919_v35  ;;  %v1008_v44 = vsel %vm976_vm12, %v2420_v0, 1073741824  ;;  %v1009_v33 = vsel %vm977_vm13, %v2431_v63, 1073741824  ;;  %vm963_vm15 = vcmp.eq.f32.partialorder %v2357_v49, %v919_v35 }
 0x1ca   : > { %v994_v42 = vsel %vm962_vm14, %v2420_v0, 1073741824  ;;  %v995_v53 = vsel %vm963_vm15, %v2431_v63, 1073741824  ;;  %v2564_v3 = vcvt.s32.f32 %v1193_v52  ;;  %v1209_v37 = vshra.s32 %v2546_v24, 16 }
 0x1cb   : > { %v2568_v45 = vsel %vm1094_vm11, %v992_v25, %v993_v43  ;;  %v943_v32 = vpop.xlane.xlu1 %942  ;;  %v922_v54 = vpop.xlane.xlu0 %921  ;;  %vm1110_vm0 = vcmp.lt.s32.totalorder %v994_v42, %v995_v53  ;;  %vm1222_vm2 = vcmp.lt.s32.totalorder %v1008_v44, %v1009_v33  ;;  %v1032_v13 = vand.u32 65535, %v2463_v48 }
 0x1cc   : > { %v1097_v1 = vshra.s32 %v2568_v45, 16  ;;  %1084 = vmin.xlane.f32.xlu1 %v2557_v28  ;;  %1196 = vmin.xlane.f32.xlu0 %v2564_v3  ;;  %vm978_vm4 = vcmp.eq.f32.partialorder %v2349_v38, %v943_v32  ;;  %vm979_vm5 = vcmp.eq.f32.partialorder %v2359_v39, %v943_v32  ;;  %1307 = vst.msk [vmem:[%s2428_s13 + $0x70] sm:$0xff] %vm1292_vm8, %v943_v32  ;;  %1300 = vst.msk [vmem:[%s2428_s13 + $0x38] sm:$0xff] %vm1292_vm8, %v922_v54 }
 0x1cd   : > { %vm964_vm6 = vcmp.eq.f32.partialorder %v2366_v6, %v922_v54  ;;  %v2580_v49 = vcvt.s32.f32 %v1209_v37  ;;  %v1010_v55 = vsel %vm978_vm4, %v2420_v0, 1073741824  ;;  %v1011_v60 = vsel %vm979_vm5, %v2431_v63, 1073741824 }
 0x1ce   : > { %vm965_vm1 = vcmp.eq.f32.partialorder %v2387_v18, %v922_v54  ;;  %v996_v4 = vsel %vm964_vm6, %v2420_v0, 1073741824  ;;  %v2587_v39 = vcvt.s32.f32 %v1097_v1  ;;  %v2590_v62 = vsel %vm1110_vm0, %v994_v42, %v995_v53 }
 0x1cf   : > { %v997_v38 = vsel %vm965_vm1, %v2431_v63, 1073741824  ;;  %v2593_v6 = vsel %vm1222_vm2, %v1008_v44, %v1009_v33  ;;  %v946_v57 = vpop.xlane.xlu0 %945  ;;  %v1113_v5 = vshra.s32 %v2590_v62, 16  ;;  %vm1238_vm7 = vcmp.lt.s32.totalorder %v1010_v55, %v1011_v60 }
 0x1d0   : > { %v1225_v11 = vshra.s32 %v2593_v6, 16  ;;  %vm1126_vm3 = vcmp.lt.s32.totalorder %v996_v4, %v997_v38  ;;  %1212 = vmin.xlane.f32.xlu1 %v2580_v49  ;;  %1100 = vmin.xlane.f32.xlu0 %v2587_v39  ;;  %vm980_vm9 = vcmp.eq.f32.partialorder %v2368_v56, %v946_v57  ;;  %vm981_vm10 = vcmp.eq.f32.partialorder %v2383_v17, %v946_v57 }
 0x1d1   : > { %1308 = vst.msk [vmem:[%s2428_s13 + $0x78] sm:$0xff] %vm1292_vm8, %v946_v57  ;;  %v2603_v18 = vsel %vm1238_vm7, %v1010_v55, %v1011_v60  ;;  %v1012_v15 = vsel %vm980_vm9, %v2420_v0, 1073741824  ;;  %v1013_v16 = vsel %vm981_vm10, %v2431_v63, 1073741824  ;;  %v2607_v12 = vcvt.s32.f32 %v1113_v5 }
 0x1d2   : > { %v2609_v21 = vcvt.s32.f32 %v1225_v11  ;;  %v1241_v9 = vshra.s32 %v2603_v18, 16  ;;  %v2612_v22 = vsel %vm1126_vm3, %v996_v4, %v997_v38  ;;  %vm1254_vm11 = vcmp.lt.s32.totalorder %v1012_v15, %v1013_v16 }
 0x1d3   : > { %v1129_v56 = vshra.s32 %v2612_v22, 16  ;;  %v2615_v17 = vsel %vm1254_vm11, %v1012_v15, %v1013_v16  ;;  %v1018_v40 = vcvt.s32.f32 %v1016_v27  ;;  %v1144_v31 = vand.u32 65535, %v2461_v41 }
 0x1d4   : > { %1116 = vmin.xlane.f32.xlu1 %v2607_v12  ;;  %1228 = vmin.xlane.f32.xlu0 %v2609_v21  ;;  %v2619_v0 = vcvt.s32.f32 %v1241_v9  ;;  %v1257_v63 = vshra.s32 %v2615_v17, 16  ;;  %v1034_v43 = vcvt.s32.f32 %v1032_v13  ;;  %v1160_v47 = vand.u32 65535, %v2465_v50 }
 0x1d5   : > { %v2622_v23 = vcvt.s32.f32 %v1129_v56  ;;  %v1146_v48 = vcvt.s32.f32 %v1144_v31  ;;  %v1048_v61 = vand.u32 65535, %v2483_v2  ;;  %v1176_v33 = vand.u32 65535, %v2496_v51 }
 0x1d6   : > { %v2626_v26 = vcvt.s32.f32 %v1257_v63  ;;  %v1162_v35 = vcvt.s32.f32 %v1160_v47  ;;  %v1064_v2 = vand.u32 65535, %v2506_v14  ;;  %v1080_v32 = vand.u32 65535, %v2525_v30 }
 0x1d7   : > { %v1178_v37 = vcvt.s32.f32 %v1176_v33  ;;  %v1192_v54 = vand.u32 65535, %v2527_v59  ;;  %v1208_v30 = vand.u32 65535, %v2546_v24  ;;  %v1096_v59 = vand.u32 65535, %v2568_v45 }
 0x1d8   : > { %1244 = vmin.xlane.f32.xlu1 %v2619_v0  ;;  %1132 = vmin.xlane.f32.xlu0 %v2622_v23  ;;  %v1082_v55 = vcvt.s32.f32 %v1080_v32  ;;  %v1112_v24 = vand.u32 65535, %v2590_v62  ;;  %v1224_v45 = vand.u32 65535, %v2593_v6  ;;  %v1240_v62 = vand.u32 65535, %v2603_v18 }
 0x1d9   : > { %v1194_v60 = vcvt.s32.f32 %v1192_v54  ;;  %v1210_v57 = vcvt.s32.f32 %v1208_v30  ;;  %v1098_v5 = vcvt.s32.f32 %v1096_v59  ;;  %v1128_v6 = vand.u32 65535, %v2612_v22 }
 0x1da   : > { %v1114_v16 = vcvt.s32.f32 %v1112_v24  ;;  %v1226_v9 = vcvt.s32.f32 %v1224_v45  ;;  %v1242_v27 = vcvt.s32.f32 %v1240_v62  ;;  %v1256_v18 = vand.u32 65535, %v2615_v17 }
 0x1db   : > { %v1130_v13 = vcvt.s32.f32 %v1128_v6 }
 0x1dc   : > { %1260 = vmin.xlane.f32.xlu0 %v2626_v26 }
 0x249   : > { %v2631_v19 = vpop.xlane.xlu1 %1020 }
 0x24a   : > { %vm1022_vm12 = vcmp.eq.f32.partialorder %v2479_v58, %v2631_v19  ;;  %v1027_v17 = vcvt.f32.s32 %v2631_v19 }
 0x24b   : > { %v1023_v34 = vsel %vm1022_vm12, %v1018_v40, inf  ;;  %v2636_v25 = vpop.xlane.xlu0 %1036  ;;  %v1258_v40 = vcvt.s32.f32 %v1256_v18 }
 0x24c   : > { %1024 = vmin.xlane.f32.xlu1 %v1023_v34  ;;  %vm1038_vm13 = vcmp.eq.f32.partialorder %v2491_v10, %v2636_v25  ;;  %v1050_v10 = vcvt.s32.f32 %v1048_v61 }
 0x24d   : > { %v2641_v36 = vpop.xlane.xlu1 %1148  ;;  %v1039_v52 = vsel %vm1038_vm13, %v1034_v43, inf  ;;  %v1028_v43 = vshll.u32 %v1027_v17, 16 }
 0x24e   : > { %vm1150_vm14 = vcmp.eq.f32.partialorder %v2498_v7, %v2641_v36  ;;  %1040 = vmin.xlane.f32.xlu0 %v1039_v52 }
 0x24f   : > { %v1151_v41 = vsel %vm1150_vm14, %v1146_v48, inf  ;;  %v2646_v58 = vpop.xlane.xlu0 %1164 }
 0x250   : > { %1152 = vmin.xlane.f32.xlu1 %v1151_v41  ;;  %vm1166_vm15 = vcmp.eq.f32.partialorder %v2503_v8, %v2646_v58  ;;  %v1066_v8 = vcvt.s32.f32 %v1064_v2  ;;  %v1171_v52 = vcvt.f32.s32 %v2646_v58 }
 0x251   : > { %v2650_v50 = vpop.xlane.xlu1 %1052  ;;  %v1167_v44 = vsel %vm1166_vm15, %v1162_v35, inf }
 0x252   : > { %vm1054_vm0 = vcmp.eq.f32.partialorder %v2501_v20, %v2650_v50  ;;  %1168 = vmin.xlane.f32.xlu0 %v1167_v44  ;;  %v1172_v33 = vshll.u32 %v1171_v52, 16 }
 0x253   : > { %v1055_v7 = vsel %vm1054_vm0, %v1050_v10, inf }
 0x254   : > { %1056 = vmin.xlane.f32.xlu1 %v1055_v7 }
 0x255   : > { %v2656_v42 = vpop.xlane.xlu1 %1180  ;;  %v2658_v53 = vpop.xlane.xlu0 %1068 }
 0x256   : > { %vm1182_vm2 = vcmp.eq.f32.partialorder %v2523_v46, %v2656_v42  ;;  %vm1070_vm4 = vcmp.eq.f32.partialorder %v2542_v29, %v2658_v53  ;;  %v1187_v58 = vcvt.f32.s32 %v2656_v42  ;;  %v1075_v32 = vcvt.f32.s32 %v2658_v53 }
 0x257   : > { %v1183_v51 = vsel %vm1182_vm2, %v1178_v37, inf  ;;  %v1071_v20 = vsel %vm1070_vm4, %v1066_v8, inf }
 0x258   : > { %1184 = vmin.xlane.f32.xlu1 %v1183_v51  ;;  %1072 = vmin.xlane.f32.xlu0 %v1071_v20  ;;  %v1188_v20 = vshll.u32 %v1187_v58, 16  ;;  %v1076_v59 = vshll.u32 %v1075_v32, 16 }
 0x259   : > { %v2666_v14 = vpop.xlane.xlu1 %1084  ;;  %v2668_v1 = vpop.xlane.xlu0 %1196 }
 0x25a   : > { %vm1086_vm5 = vcmp.eq.f32.partialorder %v2557_v28, %v2666_v14  ;;  %vm1198_vm6 = vcmp.eq.f32.partialorder %v2564_v3, %v2668_v1  ;;  %v1203_v42 = vcvt.f32.s32 %v2668_v1 }
 0x25b   : > { %v1087_v46 = vsel %vm1086_vm5, %v1082_v55, inf  ;;  %v1199_v29 = vsel %vm1198_vm6, %v1194_v60, inf  ;;  %v1091_v55 = vcvt.f32.s32 %v2666_v14 }
 0x25c   : > { %1088 = vmin.xlane.f32.xlu1 %v1087_v46  ;;  %1200 = vmin.xlane.f32.xlu0 %v1199_v29  ;;  %v1204_v14 = vshll.u32 %v1203_v42, 16 }
 0x25d   : > { %v2676_v4 = vpop.xlane.xlu1 %1212  ;;  %v2678_v38 = vpop.xlane.xlu0 %1100 }
 0x25e   : > { %vm1214_vm1 = vcmp.eq.f32.partialorder %v2580_v49, %v2676_v4  ;;  %vm1102_vm7 = vcmp.eq.f32.partialorder %v2587_v39, %v2678_v38  ;;  %v1219_v24 = vcvt.f32.s32 %v2676_v4 }
 0x25f   : > { %v1215_v28 = vsel %vm1214_vm1, %v1210_v57, inf  ;;  %v1103_v3 = vsel %vm1102_vm7, %v1098_v5, inf  ;;  %v1092_v5 = vshll.u32 %v1091_v55, 16 }
 0x260   : > { %1216 = vmin.xlane.f32.xlu1 %v1215_v28  ;;  %1104 = vmin.xlane.f32.xlu0 %v1103_v3  ;;  %v1107_v3 = vcvt.f32.s32 %v2678_v38  ;;  %v1220_v6 = vshll.u32 %v1219_v24, 16 }
 0x261   : > { %v2686_v11 = vpop.xlane.xlu1 %1116  ;;  %v2688_v15 = vpop.xlane.xlu0 %1228 }
 0x262   : > { %vm1118_vm3 = vcmp.eq.f32.partialorder %v2607_v12, %v2686_v11  ;;  %vm1230_vm9 = vcmp.eq.f32.partialorder %v2609_v21, %v2688_v15 }
 0x263   : > { %v1119_v49 = vsel %vm1118_vm3, %v1114_v16, inf  ;;  %v1231_v39 = vsel %vm1230_vm9, %v1226_v9, inf }
 0x264   : > { %1120 = vmin.xlane.f32.xlu1 %v1119_v49  ;;  %1232 = vmin.xlane.f32.xlu0 %v1231_v39  ;;  %v1123_v49 = vcvt.f32.s32 %v2686_v11 }
 0x265   : > { %v2696_v56 = vpop.xlane.xlu1 %1244  ;;  %v2698_v63 = vpop.xlane.xlu0 %1132 }
 0x266   : > { %vm1246_vm10 = vcmp.eq.f32.partialorder %v2619_v0, %v2696_v56  ;;  %vm1134_vm11 = vcmp.eq.f32.partialorder %v2622_v23, %v2698_v63  ;;  %v1043_v0 = vcvt.f32.s32 %v2636_v25  ;;  %v1155_v23 = vcvt.f32.s32 %v2641_v36 }
 0x267   : > { %v1247_v12 = vsel %vm1246_vm10, %v1242_v27, inf  ;;  %v1135_v21 = vsel %vm1134_vm11, %v1130_v13, inf  ;;  %v1059_v36 = vcvt.f32.s32 %v2650_v50  ;;  %v1108_v27 = vshll.u32 %v1107_v3, 16 }
 0x268   : > { %1248 = vmin.xlane.f32.xlu1 %v1247_v12  ;;  %1136 = vmin.xlane.f32.xlu0 %v1135_v21  ;;  %v1044_v48 = vshll.u32 %v1043_v0, 16  ;;  %v1156_v41 = vshll.u32 %v1155_v23, 16  ;;  %v1235_v13 = vcvt.f32.s32 %v2688_v15 }
 0x269   : > { %v2705_v22 = vpop.xlane.xlu0 %1260  ;;  %v1060_v8 = vshll.u32 %v1059_v36, 16 }
 0x26a   : > { %vm1262_vm12 = vcmp.eq.f32.partialorder %v2626_v26, %v2705_v22  ;;  %v1236_v0 = vshll.u32 %v1235_v13, 16 }
 0x26b   : > { %v1263_v31 = vsel %vm1262_vm12, %v1258_v40, inf  ;;  %v1124_v40 = vshll.u32 %v1123_v49, 16 }
 0x26c   : > { %1264 = vmin.xlane.f32.xlu0 %v1263_v31  ;;  %v1251_v31 = vcvt.f32.s32 %v2696_v56 }
 0x2d9   : > { %v1025_v34 = vpop.xlane.xlu1 %1024 }
 0x2da   : > { %v1026_v47 = vcvt.f32.s32 %v1025_v34  ;;  %v1139_v34 = vcvt.f32.s32 %v2698_v63 }
 0x2db   : > { %v1041_v26 = vpop.xlane.xlu0 %1040 }
 0x2dc   : > { %v1029_v19 = vadd.s32 %v1028_v43, %v1026_v47  ;;  %v1042_v61 = vcvt.f32.s32 %v1041_v26  ;;  %v1252_v26 = vshll.u32 %v1251_v31, 16  ;;  %v1140_v52 = vshll.u32 %v1139_v34, 16 }
 0x2dd   : > { %v1153_v25 = vpop.xlane.xlu1 %1152 }
 0x2de   : > { %1309 = vst.msk [vmem:[%s2717_s17] sm:$0xff] %vm1292_vm8, %v1029_v19  ;;  %v1154_v35 = vcvt.f32.s32 %v1153_v25  ;;  %v1045_v10 = vadd.s32 %v1044_v48, %v1042_v61  ;;  %v1267_v19 = vcvt.f32.s32 %v2705_v22 }
 0x2df   : > { %v1169_v44 = vpop.xlane.xlu0 %1168 }
 0x2e0   : > { %v1157_v2 = vadd.s32 %v1156_v41, %v1154_v35  ;;  %1310 = vst.msk [vmem:[%s2717_s17 + $0x8] sm:$0xff] %vm1292_vm8, %v1045_v10  ;;  %v1170_v7 = vcvt.f32.s32 %v1169_v44  ;;  %v1268_v35 = vshll.u32 %v1267_v19, 16 }
 0x2e1   : > { %v1057_v37 = vpop.xlane.xlu1 %1056 }
 0x2e2   : > { %1317 = vst.msk [vmem:[%s2717_s17 + $0x40] sm:$0xff] %vm1292_vm8, %v1157_v2  ;;  %v1058_v50 = vcvt.f32.s32 %v1057_v37  ;;  %v1173_v54 = vadd.s32 %v1172_v33, %v1170_v7 }
 0x2e4   : > { %v1061_v51 = vadd.s32 %v1060_v8, %v1058_v50  ;;  %1318 = vst.msk [vmem:[%s2717_s17 + $0x48] sm:$0xff] %vm1292_vm8, %v1173_v54 }
 0x2e5   : > { %v1185_v60 = vpop.xlane.xlu1 %1184  ;;  %v1073_v30 = vpop.xlane.xlu0 %1072 }
 0x2e6   : > { %1311 = vst.msk [vmem:[%s2717_s17 + $0x10] sm:$0xff] %vm1292_vm8, %v1061_v51  ;;  %v1186_v53 = vcvt.f32.s32 %v1185_v60  ;;  %v1074_v46 = vcvt.f32.s32 %v1073_v30 }
 0x2e8   : > { %v1189_v29 = vadd.s32 %v1188_v20, %v1186_v53  ;;  %v1077_v57 = vadd.s32 %v1076_v59, %v1074_v46 }
 0x2e9   : > { %v1089_v45 = vpop.xlane.xlu1 %1088  ;;  %v1201_v28 = vpop.xlane.xlu0 %1200 }
 0x2ea   : > { %1319 = vst.msk [vmem:[%s2717_s17 + $0x50] sm:$0xff] %vm1292_vm8, %v1189_v29  ;;  %1312 = vst.msk [vmem:[%s2717_s17 + $0x18] sm:$0xff] %vm1292_vm8, %v1077_v57  ;;  %v1090_v1 = vcvt.f32.s32 %v1089_v45  ;;  %v1202_v16 = vcvt.f32.s32 %v1201_v28 }
 0x2ec   : > { %v1093_v9 = vadd.s32 %v1092_v5, %v1090_v1  ;;  %v1205_v62 = vadd.s32 %v1204_v14, %v1202_v16 }
 0x2ed   : > { %v1217_v39 = vpop.xlane.xlu1 %1216  ;;  %v1105_v4 = vpop.xlane.xlu0 %1104 }
 0x2ee   : > { %1313 = vst.msk [vmem:[%s2717_s17 + $0x20] sm:$0xff] %vm1292_vm8, %v1093_v9  ;;  %1320 = vst.msk [vmem:[%s2717_s17 + $0x58] sm:$0xff] %vm1292_vm8, %v1205_v62  ;;  %v1218_v38 = vcvt.f32.s32 %v1217_v39  ;;  %v1106_v18 = vcvt.f32.s32 %v1105_v4 }
 0x2f0   : > { %v1221_v12 = vadd.s32 %v1220_v6, %v1218_v38  ;;  %v1109_v21 = vadd.s32 %v1108_v27, %v1106_v18 }
 0x2f1   : > { %v1121_v11 = vpop.xlane.xlu1 %1120  ;;  %v1233_v17 = vpop.xlane.xlu0 %1232 }
 0x2f2   : > { %1321 = vst.msk [vmem:[%s2717_s17 + $0x60] sm:$0xff] %vm1292_vm8, %v1221_v12  ;;  %1314 = vst.msk [vmem:[%s2717_s17 + $0x28] sm:$0xff] %vm1292_vm8, %v1109_v21  ;;  %v1122_v15 = vcvt.f32.s32 %v1121_v11  ;;  %v1234_v43 = vcvt.f32.s32 %v1233_v17 }
 0x2f4   : > { %v1125_v23 = vadd.s32 %v1124_v40, %v1122_v15  ;;  %v1237_v47 = vadd.s32 %v1236_v0, %v1234_v43 }
 0x2f5   : > { %v1249_v48 = vpop.xlane.xlu1 %1248  ;;  %v1137_v56 = vpop.xlane.xlu0 %1136 }
 0x2f6   : > { %1315 = vst.msk [vmem:[%s2717_s17 + $0x30] sm:$0xff] %vm1292_vm8, %v1125_v23  ;;  %1322 = vst.msk [vmem:[%s2717_s17 + $0x68] sm:$0xff] %vm1292_vm8, %v1237_v47  ;;  %v1250_v63 = vcvt.f32.s32 %v1249_v48  ;;  %v1138_v61 = vcvt.f32.s32 %v1137_v56 }
 0x2f8   : > { %v1253_v25 = vadd.s32 %v1252_v26, %v1250_v63  ;;  %v1141_v41 = vadd.s32 %v1140_v52, %v1138_v61 }
 0x2f9   : > { %v1265_v36 = vpop.xlane.xlu0 %1264 }
 0x2fa   : > { %1323 = vst.msk [vmem:[%s2717_s17 + $0x70] sm:$0xff] %vm1292_vm8, %v1253_v25  ;;  %1316 = vst.msk [vmem:[%s2717_s17 + $0x38] sm:$0xff] %vm1292_vm8, %v1141_v41  ;;  %v1266_v10 = vcvt.f32.s32 %v1265_v36 }
 0x2fc   : > { %v1269_v44 = vadd.s32 %v1268_v35, %v1266_v10 }
 0x2fe   : > { %1324 = vst.msk [vmem:[%s2717_s17 + $0x78] sm:$0xff] %vm1292_vm8, %v1269_v44 }
 0x2ff PF: > { %s17_s23 = sadd.s32 1, %s1885_s23   ;;  %s2808_s21 = smov %s1881_s22 }
 0x300   : > { %p14_p7 = scmp.ge.s32.totalorder %s17_s23, 4   ;;  %s2809_s22 = smov %s2811_s24 }
 0x302   :  { %16 = sbr.rel (!%p14_p7) target bundleno = 2 (0x2), region = 107 }

// kernel: semla_forward.5
= control target key start
LH: loop header
LB: loop body
LE: loop exit
PB: predicated region body
PF: predicated region fallthrough
CT: control target
= control target key end

     0   :  { %vm30_vm0 = vcmask 130048   ;;  %s451_s0 = inlined_call_operand.vmem [shape: f32[128,16], index: 0, kind: input, shape index: {}]   ;;  %s452_s1 = inlined_call_operand.vmem [shape: f32[16,128], index: 1, kind: input, shape index: {}]   ;;  %s453_s2 = inlined_call_operand.hbm [shape: f32[128,128], index: 2, kind: output, shape index: {}]  }
   0x1   :  { %v28_v0 = vld [vmem:[%s452_s1] sm:$0xff]  ;;  %v29_v1 = vld [vmem:[%s452_s1 + $0x8] sm:$0xff]  ;;  %v14_v7 = vld [vmem:[%s451_s0 + $0x10] sm:$0xff] }
   0x2   :  { %v12_v2 = vld [vmem:[%s451_s0] sm:$0xff]  ;;  %v318_v3 = vpack.c.bf16 %v29_v1, %v28_v0  ;;  %v13_v5 = vld [vmem:[%s451_s0 + $0x8] sm:$0xff]  ;;  %v22_v8 = vld [vmem:[%s451_s0 + $0x50] sm:$0xff] }
   0x3   :  { %294 = vmatprep.mubr.msk.f32.mxu0 %vm30_vm0, %v12_v2  ;;  %v20_v4 = vld [vmem:[%s451_s0 + $0x40] sm:$0xff]  ;;  %v21_v6 = vld [vmem:[%s451_s0 + $0x48] sm:$0xff] }
   0x4   :  { %306 = vmatprep.mubr.msk.f32.mxu1 %vm30_vm0, %v20_v4  ;;  %319 = vmatprep.subr.bf16.mxu0 %v318_v3 }
   0x5   :  { %322 = vmatprep.subr.bf16.mxu1 %v318_v3  ;;  %321 = vmatpush3.bf16.msra.mxu0 %v318_v3 }
   0x6   :  { %323 = vmatpush3.bf16.msra.mxu1 %v318_v3 }
   0x7   :  { %7 = vsyncpa [#allocation3], 0  ;;  %v15_v9 = vld [vmem:[%s451_s0 + $0x18] sm:$0xff]  ;;  %v16_v11 = vld [vmem:[%s451_s0 + $0x20] sm:$0xff] }
   0x8   :  { %295 = vmatmul.mubr.msk.f32.vlgmr.msra.gmra.mrb[0].mxu0 %vm30_vm0, %v13_v5  ;;  %v23_v10 = vld [vmem:[%s451_s0 + $0x58] sm:$0xff]  ;;  %v24_v12 = vld [vmem:[%s451_s0 + $0x60] sm:$0xff]  ;;  %v17_v13 = vld [vmem:[%s451_s0 + $0x28] sm:$0xff] }
   0x9   :  { %307 = vmatmul.mubr.msk.f32.vlgmr.msra.gmra.mrb[0].mxu1 %vm30_vm0, %v21_v6  ;;  %297 = vmatprep.mubr.msk.f32.mxu0 %vm30_vm0, %v14_v7  ;;  %v25_v14 = vld [vmem:[%s451_s0 + $0x68] sm:$0xff]  ;;  %v18_v15 = vld [vmem:[%s451_s0 + $0x30] sm:$0xff]  ;;  %v19_v17 = vld [vmem:[%s451_s0 + $0x38] sm:$0xff] }
   0xa   :  { %309 = vmatprep.mubr.msk.f32.mxu1 %vm30_vm0, %v22_v8  ;;  %v26_v16 = vld [vmem:[%s451_s0 + $0x70] sm:$0xff]  ;;  %v27_v18 = vld [vmem:[%s451_s0 + $0x78] sm:$0xff]  ;;  %s351_s0 = smov [#allocation2]  }
   0xb   :  { %s245_s16 = sshll.u32 %s351_s0, 4  ;;  %s246_s16 = int_to_ptr.vmem [resolvable:$true] %s245_s16 }
   0xc   :  { %298 = vmatmul.mubr.msk.f32.gmra.mrb[2].mxu0 %vm30_vm0, %v15_v9  ;;  %s327_s17 = scalar_lea.vmem %s246_s16, 2048  ;;  %p332_p1 = scmp.lt.s32.totalorder %s246_s16, %s246_s16 }
   0xd   :  { %310 = vmatmul.mubr.msk.f32.gmra.mrb[2].mxu1 %vm30_vm0, %v23_v10  ;;  %300 = vmatprep.mubr.msk.f32.mxu0 %vm30_vm0, %v16_v11  ;;  %p328_p0 = scmp.ne.s32.totalorder %s246_s16, %s327_s17  ;;  %p333_p2 = scmp.lt.s32.totalorder %s327_s17, %s327_s17 }
   0xe   :  { %312 = vmatprep.mubr.msk.f32.mxu1 %vm30_vm0, %v24_v12 }
   0xf   :  { %p334_p3 = por %p333_p2, %p332_p1 }
  0x10   :  { %301 = vmatmul.mubr.msk.f32.gmra.mrb[4].mxu0 %vm30_vm0, %v17_v13 }
  0x11   :  { %313 = vmatmul.mubr.msk.f32.gmra.mrb[4].mxu1 %vm30_vm0, %v25_v14  ;;  %303 = vmatprep.mubr.msk.f32.mxu0 %vm30_vm0, %v18_v15  ;;  %p335_p4 = pnand %p334_p3, %p328_p0 }
  0x12   :  { %315 = vmatprep.mubr.msk.f32.mxu1 %vm30_vm0, %v26_v16 }
  0x14   :  { %304 = vmatmul.mubr.msk.f32.gmra.mrb[6].mxu0 %vm30_vm0, %v19_v17 }
  0x15   :  { %316 = vmatmul.mubr.msk.f32.gmra.mrb[6].mxu1 %vm30_vm0, %v27_v18 }
  0xdb   :  { %v296_v19 = vpop.f32.mrb[0].mxu0 }
  0xdc   :  { %v308_v20 = vpop.f32.mrb[0].mxu1  ;;  %225 = vst [vmem:[#allocation2 + $0x8] sm:$0xff] %v296_v19  ;;  %v145_v21 = vpop.f32.mrb[1].mxu0 }
  0xdd   :  { %233 = vst [vmem:[#allocation2 + $0x48] sm:$0xff] %v308_v20  ;;  %v185_v22 = vpop.f32.mrb[1].mxu1  ;;  %224 = vst [vmem:[#allocation2] sm:$0xff] %v145_v21 }
  0xde   :  { %232 = vst [vmem:[#allocation2 + $0x40] sm:$0xff] %v185_v22 }
  0xdf   :  { %v299_v23 = vpop.f32.mrb[2].mxu0 }
  0xe0   :  { %v311_v24 = vpop.f32.mrb[2].mxu1  ;;  %227 = vst [vmem:[#allocation2 + $0x18] sm:$0xff] %v299_v23  ;;  %v155_v25 = vpop.f32.mrb[3].mxu0 }
  0xe1   :  { %235 = vst [vmem:[#allocation2 + $0x58] sm:$0xff] %v311_v24  ;;  %v195_v26 = vpop.f32.mrb[3].mxu1  ;;  %226 = vst [vmem:[#allocation2 + $0x10] sm:$0xff] %v155_v25 }
  0xe2   :  { %234 = vst [vmem:[#allocation2 + $0x50] sm:$0xff] %v195_v26 }
  0xe3   :  { %v302_v27 = vpop.f32.mrb[4].mxu0 }
  0xe4   :  { %v314_v28 = vpop.f32.mrb[4].mxu1  ;;  %229 = vst [vmem:[#allocation2 + $0x28] sm:$0xff] %v302_v27  ;;  %v165_v29 = vpop.f32.mrb[5].mxu0 }
  0xe5   :  { %237 = vst [vmem:[#allocation2 + $0x68] sm:$0xff] %v314_v28  ;;  %v205_v30 = vpop.f32.mrb[5].mxu1  ;;  %228 = vst [vmem:[#allocation2 + $0x20] sm:$0xff] %v165_v29 }
  0xe6   :  { %236 = vst [vmem:[#allocation2 + $0x60] sm:$0xff] %v205_v30 }
  0xe7   :  { %v305_v31 = vpop.f32.mrb[6].mxu0 }
  0xe8   :  { %v317_v32 = vpop.f32.mrb[6].mxu1  ;;  %231 = vst [vmem:[#allocation2 + $0x38] sm:$0xff] %v305_v31  ;;  %v175_v33 = vpop.f32.mrb[7].mxu0 }
  0xe9   :  { %239 = vst [vmem:[#allocation2 + $0x78] sm:$0xff] %v317_v32  ;;  %v215_v34 = vpop.f32.mrb[7].mxu1  ;;  %230 = vst [vmem:[#allocation2 + $0x30] sm:$0xff] %v175_v33 }
  0xea   :  { %238 = vst [vmem:[#allocation2 + $0x70] sm:$0xff] %v215_v34 }
  0xeb   :  { %338 = shalt.err (!%p335_p4)
}
  0xec   :  { %s339_s19 = scalar_lea.hbm %s453_s2, 2048 }
  0xed   :  { %p340_p5 = scmp.ne.s32.totalorder %s453_s2, %s339_s19  ;;  %p343_p6 = scmp.lt.u32.totalorder %s339_s19, %s453_s2 }
  0xef   :  { %p345_p7 = pnand %p343_p6, %p340_p5 }
  0xf1   :  { %348 = shalt.err (!%p345_p7)
}
  0xf2   :  { %s352_s24 = smov 128   ;;  %s353_s25 = smov 8  }
  0xf3   :  { %251 = dma.vmem_to_hbm [thread:$0]  %s246_s16, 2048, %s453_s2, [#allocation3], %s352_s24, %s352_s24, %s353_s25  }
  0xf4   :  { %349 = dma.done.wait [#allocation3], 2048  }
  0xf5   :  { %350 = vsyncadd [#allocation3], 4294965248 }
  0xf6   :  { %255 = vsyncpa [#allocation3], 1 }

</bundles_post_ra>
